<compile_context>
chip_gen: v7x
topology: tpu7x:2x2x1
jax: 0.10.0
libtpu: 0.0.40
codegen_flags: <defaults>
</compile_context>

<pallas_src>
import jax
import jax.numpy as jnp
from jax.experimental import pallas as pl
from jax.experimental.pallas import tpu as pltpu


def basic_block_se_kernel(xp_ref, short_ref, w1_ref, s1_ref, b1_ref,
                          w2_ref, s2_ref, b2_ref, pool_ref,
                          fc1w_ref, fc1b_ref, fc2w_ref, fc2b_ref,
                          out_ref, pad_ref):
    N, Hp, WpC = xp_ref.shape            # padded input (N, H+2, (W+2)*C), bf16
    H = Hp - 2
    WC = out_ref.shape[-1]               # W * C  (lane-dense channel-minor layout)
    C = pool_ref.shape[-1]

    # ---- conv1: one deep-K bf16 MXU matmul against the banded weight matrix.
    #      lhs row (n,h) = [xp[n,h,:] | xp[n,h+1,:] | xp[n,h+2,:]]  -> (N*H, 3*(W+2)*C)
    lhs1 = jnp.concatenate(
        [xp_ref[:, ky:ky + H, :].reshape(N * H, WpC) for ky in range(3)], axis=-1)
    acc1 = jnp.dot(lhs1, w1_ref[...], preferred_element_type=jnp.float32)  # (N*H, W*C) f32

    # bn1 (folded eval-mode scale/bias, pre-tiled over W in the wrapper) + relu
    h1 = jnp.maximum(acc1 * s1_ref[...] + b1_ref[...], 0.0)

    # ---- stage conv2 input: write h1 (bf16) into padded scratch; zero ONLY the halo.
    zero_row = jnp.zeros((N, 1, WpC), pad_ref.dtype)
    pad_ref[:, 0:1, :] = zero_row
    pad_ref[:, Hp - 1:Hp, :] = zero_row
    zero_col = jnp.zeros((N, Hp, C), pad_ref.dtype)
    pad_ref[:, :, 0:C] = zero_col
    pad_ref[:, :, WpC - C:WpC] = zero_col
    pad_ref[:, 1:H + 1, C:C + WC] = h1.astype(pad_ref.dtype).reshape(N, H, WC)

    # ---- conv2: same banded single-matmul formulation
    lhs2 = jnp.concatenate(
        [pad_ref[:, ky:ky + H, :].reshape(N * H, WpC) for ky in range(3)], axis=-1)
    acc2 = jnp.dot(lhs2, w2_ref[...], preferred_element_type=jnp.float32)
    original = acc2 * s2_ref[...] + b2_ref[...]              # bn2 (no relu), (N*H, W*C) f32
    orig3 = original.reshape(N, H, WC)                       # lane-dense 3-D view

    # ---- SE: global avg pool = sublane reduce over H, then a tiny MXU matmul that
    #      folds the W reduction and the 1/(H*W) factor (pool_ref is (W*C, C)).
    col_sum = jnp.sum(orig3, axis=1)                                        # (N, W*C)
    pooled = jnp.dot(col_sum, pool_ref[...], preferred_element_type=jnp.float32)  # (N, C)
    z = jnp.maximum(
        jnp.dot(pooled.astype(jnp.bfloat16), fc1w_ref[...],
                preferred_element_type=jnp.float32) + fc1b_ref[...], 0.0)   # (N, mid)
    logits = jnp.dot(z.astype(jnp.bfloat16), fc2w_ref[...],
                     preferred_element_type=jnp.float32) + fc2b_ref[...]    # (N, W*C)
    gate = pl.reciprocal(1.0 + jnp.exp(-logits), approx=True)  # sigmoid (exp + recip on EUP)

    # ---- channel scale + identity shortcut + final relu, all lane-dense (N, H, W*C)
    out = orig3 * gate.reshape(N, 1, WC) + short_ref[...]
    out_ref[...] = jnp.maximum(out, 0.0).astype(out_ref.dtype)


def _band_conv_weight(w_oihw, W):
    """OIHW 3x3 conv weight -> banded matmul weight of shape (3*(W+2)*Cin, W*Cout).

    With lhs rows laid out as [padded row y | y+1 | y+2], each flattened channel-minor
    to (W+2)*Cin, a single lhs @ band matmul computes the whole 3x3 conv for an output
    row, already in the lane-dense (W*Cout) layout."""
    Cout, Cin, KH, KW = w_oihw.shape
    Wp = W + 2
    wt = jnp.transpose(w_oihw, (2, 3, 1, 0))                     # (ky, kx, Cin, Cout)
    wx = jnp.arange(Wp)[:, None]
    wo = jnp.arange(W)[None, :]
    sel = jnp.stack([(wx == wo + kx) for kx in range(KW)], axis=0).astype(w_oihw.dtype)
    band = jnp.einsum('kxw,ykio->yxiwo', sel, wt)                # (KH, Wp, Cin, W, Cout)
    return band.reshape(KH * Wp * Cin, W * Cout)


def basic_block_se(x_nchw, params):
    """x_nchw: [N, C, H, W] float32 (PyTorch convention). Returns NCHW float32."""
    (w1, s1, b1, w2, s2, b2, fc1w, fc1b, fc2w, fc2b) = params
    N, C, H, W = x_nchw.shape
    mid = fc1w.shape[0]
    Hp, Wp = H + 2, W + 2
    WC, WpC = W * C, Wp * C

    # NCHW -> NHWC, zero-pad, flatten (W, C) into the lane axis; bf16 matmul input.
    x_nhwc = jnp.transpose(x_nchw, (0, 2, 3, 1))
    xp = jnp.pad(x_nhwc, ((0, 0), (1, 1), (1, 1), (0, 0)))
    xp_flat = xp.reshape(N, Hp, WpC).astype(jnp.bfloat16)
    shortcut = x_nhwc.reshape(N, H, WC)                          # f32 identity shortcut

    # conv weights -> banded bf16 matmul weights (one deep-K matmul per conv)
    w1_band = _band_conv_weight(w1, W).astype(jnp.bfloat16)      # (3*Wp*C, W*C)
    w2_band = _band_conv_weight(w2, W).astype(jnp.bfloat16)

    # folded BN scale/bias, tiled ONCE over W to match the (W*C) lane layout
    s1_wc = jnp.tile(s1, W).reshape(1, WC)
    b1_wc = jnp.tile(b1, W).reshape(1, WC)
    s2_wc = jnp.tile(s2, W).reshape(1, WC)
    b2_wc = jnp.tile(b2, W).reshape(1, WC)

    # global-average-pool as a (W*C, C) matmul (folds the W reduction and 1/(H*W))
    pool_mat = jnp.tile(jnp.eye(C, dtype=jnp.float32), (W, 1)) / float(H * W)

    # SE fc weights; fc2 weight/bias pre-tiled over W so the gate is lane-dense
    fc1w_k = fc1w.T.astype(jnp.bfloat16)                         # (C, mid)
    fc1b_k = fc1b.reshape(1, mid)
    fc2w_wc = jnp.tile(fc2w.T, (1, W)).astype(jnp.bfloat16)      # (mid, W*C)
    fc2b_wc = jnp.tile(fc2b, W).reshape(1, WC)

    vmem = pl.BlockSpec(memory_space=pltpu.MemorySpace.VMEM)
    out_ld = pl.pallas_call(
        basic_block_se_kernel,
        out_shape=jax.ShapeDtypeStruct((N, H, WC), jnp.float32),
        in_specs=[vmem] * 13,
        out_specs=vmem,
        scratch_shapes=[pltpu.VMEM((N, Hp, WpC), jnp.bfloat16)],
    )(xp_flat, shortcut, w1_band, s1_wc, b1_wc, w2_band, s2_wc, b2_wc,
      pool_mat, fc1w_k, fc1b_k, fc2w_wc, fc2b_wc)

    return jnp.transpose(out_ld.reshape(N, H, W, C), (0, 3, 1, 2))


def reference(x_nchw, params):
    """Pure-JAX f32 reference matching the PyTorch forward (eval-mode BN)."""
    (w1, s1, b1, w2, s2, b2, fc1w, fc1b, fc2w, fc2b) = params

    def conv3x3(x, w):
        return jax.lax.conv_general_dilated(
            x, w, window_strides=(1, 1), padding=((1, 1), (1, 1)),
            dimension_numbers=('NCHW', 'OIHW', 'NCHW'))

    h = conv3x3(x_nchw, w1)
    h = h * s1[None, :, None, None] + b1[None, :, None, None]
    h = jnp.maximum(h, 0.0)
    h = conv3x3(h, w2)
    original = h * s2[None, :, None, None] + b2[None, :, None, None]
    pooled = jnp.mean(original, axis=(2, 3))                   # [N, C]
    z = jnp.maximum(pooled @ fc1w.T + fc1b, 0.0)
    gate = jax.nn.sigmoid(z @ fc2w.T + fc2b)
    out = original * gate[:, :, None, None] + x_nchw           # identity shortcut
    return jnp.maximum(out, 0.0)


def init_params(key, in_planes, planes, eps=1e-5):
    """Deterministic synthetic parameters; BN folded into scale/bias (eval mode)."""
    assert in_planes == planes, "identity-shortcut configuration only"
    mid = round(planes / 4)
    ks = jax.random.split(key, 14)
    conv1_w = 0.1 * jax.random.normal(ks[0], (planes, in_planes, 3, 3), jnp.float32)
    conv2_w = 0.1 * jax.random.normal(ks[1], (planes, planes, 3, 3), jnp.float32)

    def bn_fold(kg, kb, km, kv):
        gamma = 1.0 + 0.1 * jax.random.normal(kg, (planes,), jnp.float32)
        beta = 0.1 * jax.random.normal(kb, (planes,), jnp.float32)
        mean = 0.05 * jax.random.normal(km, (planes,), jnp.float32)
        var = 0.5 + jnp.abs(jax.random.normal(kv, (planes,), jnp.float32))
        scale = gamma / jnp.sqrt(var + eps)
        bias = beta - mean * scale
        return scale, bias

    s1, b1 = bn_fold(ks[2], ks[3], ks[4], ks[5])
    s2, b2 = bn_fold(ks[6], ks[7], ks[8], ks[9])
    fc1_w = 0.2 * jax.random.normal(ks[10], (mid, planes), jnp.float32)   # torch [out,in]
    fc1_b = 0.1 * jax.random.normal(ks[11], (mid,), jnp.float32)
    fc2_w = 0.2 * jax.random.normal(ks[12], (planes, mid), jnp.float32)
    fc2_b = 0.1 * jax.random.normal(ks[13], (planes,), jnp.float32)
    return (conv1_w, s1, b1, conv2_w, s2, b2, fc1_w, fc1_b, fc2_w, fc2_b)


if __name__ == "__main__":
    key = jax.random.PRNGKey(0)
    k_x, k_p = jax.random.split(key)

    N, C, H, W = 2, 16, 16, 16          # in_planes = planes = 16, stride = 1
    x = jax.random.normal(k_x, (N, C, H, W), jnp.float32)
    params = init_params(k_p, C, C)

    out = jax.block_until_ready(jax.jit(basic_block_se)(x, params))
    ref = jax.block_until_ready(reference(x, params))

    assert out.shape == (N, C, H, W)
    # bf16 MXU inputs + approx-reciprocal sigmoid -> bf16-level tolerance vs f32 reference.
    assert jnp.allclose(out, ref, atol=1e-1, rtol=1e-1), float(jnp.max(jnp.abs(out - ref)))
    print("KERNEL_OK")
</pallas_src>

<mosaic_0001>
module attributes {stable_mosaic.version = 11 : i64} {
  func.func @basic_block_se_kernel(%arg0: memref<2x18x288xbf16, #tpu.memory_space<vmem>>, %arg1: memref<2x16x256xf32, #tpu.memory_space<vmem>>, %arg2: memref<864x256xbf16, #tpu.memory_space<vmem>>, %arg3: memref<1x256xf32, #tpu.memory_space<vmem>>, %arg4: memref<1x256xf32, #tpu.memory_space<vmem>>, %arg5: memref<864x256xbf16, #tpu.memory_space<vmem>>, %arg6: memref<1x256xf32, #tpu.memory_space<vmem>>, %arg7: memref<1x256xf32, #tpu.memory_space<vmem>>, %arg8: memref<256x16xf32, #tpu.memory_space<vmem>>, %arg9: memref<16x4xbf16, #tpu.memory_space<vmem>>, %arg10: memref<1x4xf32, #tpu.memory_space<vmem>>, %arg11: memref<4x256xbf16, #tpu.memory_space<vmem>>, %arg12: memref<1x256xf32, #tpu.memory_space<vmem>>, %arg13: memref<2x16x256xf32, #tpu.memory_space<vmem>>, %arg14: memref<2x18x288xbf16, #tpu.memory_space<vmem>>) attributes {dimension_semantics = [], scalar_prefetch = 0 : i64, scratch_operands = 1 : i64, tpu.core_type = #tpu.core_type<tc>} {
    %c0 = arith.constant 0 : index
    %c0_0 = arith.constant 0 : index
    %c0_1 = arith.constant 0 : index
    %0 = vector.load %arg0[%c0, %c0_0, %c0_1] : memref<2x18x288xbf16, #tpu.memory_space<vmem>>, vector<2x16x288xbf16>
    %1 = vector.shape_cast %0 : vector<2x16x288xbf16> to vector<32x288xbf16>
    %c0_2 = arith.constant 0 : index
    %c1 = arith.constant 1 : index
    %c0_3 = arith.constant 0 : index
    %2 = vector.load %arg0[%c0_2, %c1, %c0_3] : memref<2x18x288xbf16, #tpu.memory_space<vmem>>, vector<2x16x288xbf16>
    %3 = vector.shape_cast %2 : vector<2x16x288xbf16> to vector<32x288xbf16>
    %c0_4 = arith.constant 0 : index
    %c2 = arith.constant 2 : index
    %c0_5 = arith.constant 0 : index
    %4 = vector.load %arg0[%c0_4, %c2, %c0_5] : memref<2x18x288xbf16, #tpu.memory_space<vmem>>, vector<2x16x288xbf16>
    %5 = vector.shape_cast %4 : vector<2x16x288xbf16> to vector<32x288xbf16>
    %6 = tpu.concatenate %1, %3, %5 in 1 : vector<32x288xbf16>, vector<32x288xbf16>, vector<32x288xbf16> -> vector<32x864xbf16>
    %c0_6 = arith.constant 0 : index
    %c0_7 = arith.constant 0 : index
    %7 = vector.load %arg2[%c0_6, %c0_7] : memref<864x256xbf16, #tpu.memory_space<vmem>>, vector<864x256xbf16>
    %cst = arith.constant dense<0.000000e+00> : vector<32x256xf32>
    %8 = tpu.matmul %6, %7, %cst {dimension_numbers = #tpu.dot_dimension_numbers<[1], [0], [0], [1], [0, 0, 1, 1], [], []>} : vector<32x864xbf16>, vector<864x256xbf16>, vector<32x256xf32> -> vector<32x256xf32>
    %c0_8 = arith.constant 0 : index
    %c0_9 = arith.constant 0 : index
    %9 = vector.load %arg3[%c0_8, %c0_9] : memref<1x256xf32, #tpu.memory_space<vmem>>, vector<1x256xf32>
    %10 = vector.broadcast %9 : vector<1x256xf32> to vector<32x256xf32>
    %11 = arith.mulf %8, %10 : vector<32x256xf32>
    %c0_10 = arith.constant 0 : index
    %c0_11 = arith.constant 0 : index
    %12 = vector.load %arg4[%c0_10, %c0_11] : memref<1x256xf32, #tpu.memory_space<vmem>>, vector<1x256xf32>
    %13 = vector.broadcast %12 : vector<1x256xf32> to vector<32x256xf32>
    %14 = arith.addf %11, %13 : vector<32x256xf32>
    %cst_12 = arith.constant 0.000000e+00 : f32
    %15 = vector.broadcast %cst_12 : f32 to vector<32x256xf32>
    %16 = arith.maximumf %14, %15 : vector<32x256xf32>
    %cst_13 = arith.constant 0.000000e+00 : bf16
    %17 = vector.broadcast %cst_13 : bf16 to vector<2x1x288xbf16>
    %c0_14 = arith.constant 0 : index
    %c0_15 = arith.constant 0 : index
    %c0_16 = arith.constant 0 : index
    %18 = vector.load %arg14[%c0_14, %c0_15, %c0_16] : memref<2x18x288xbf16, #tpu.memory_space<vmem>>, vector<2x1x288xbf16>
    tpu.vector_store %arg14[%c0_14, %c0_15, %c0_16], %17 {strides = array<i32>} : memref<2x18x288xbf16, #tpu.memory_space<vmem>>, vector<2x1x288xbf16>,
    %c0_17 = arith.constant 0 : index
    %c17 = arith.constant 17 : index
    %c0_18 = arith.constant 0 : index
    %19 = vector.load %arg14[%c0_17, %c17, %c0_18] : memref<2x18x288xbf16, #tpu.memory_space<vmem>>, vector<2x1x288xbf16>
    tpu.vector_store %arg14[%c0_17, %c17, %c0_18], %17 {strides = array<i32>} : memref<2x18x288xbf16, #tpu.memory_space<vmem>>, vector<2x1x288xbf16>,
    %cst_19 = arith.constant 0.000000e+00 : bf16
    %20 = vector.broadcast %cst_19 : bf16 to vector<2x18x16xbf16>
    %c0_20 = arith.constant 0 : index
    %c0_21 = arith.constant 0 : index
    %c0_22 = arith.constant 0 : index
    %21 = vector.load %arg14[%c0_20, %c0_21, %c0_22] : memref<2x18x288xbf16, #tpu.memory_space<vmem>>, vector<2x18x16xbf16>
    tpu.vector_store %arg14[%c0_20, %c0_21, %c0_22], %20 {strides = array<i32>} : memref<2x18x288xbf16, #tpu.memory_space<vmem>>, vector<2x18x16xbf16>,
    %c0_23 = arith.constant 0 : index
    %c0_24 = arith.constant 0 : index
    %c272 = arith.constant 272 : index
    %22 = vector.load %arg14[%c0_23, %c0_24, %c272] : memref<2x18x288xbf16, #tpu.memory_space<vmem>>, vector<2x18x16xbf16>
    tpu.vector_store %arg14[%c0_23, %c0_24, %c272], %20 {strides = array<i32>} : memref<2x18x288xbf16, #tpu.memory_space<vmem>>, vector<2x18x16xbf16>,
    %23 = arith.truncf %16 : vector<32x256xf32> to vector<32x256xbf16>
    %24 = vector.shape_cast %23 : vector<32x256xbf16> to vector<2x16x256xbf16>
    %c0_25 = arith.constant 0 : index
    %c1_26 = arith.constant 1 : index
    %c16 = arith.constant 16 : index
    %25 = vector.load %arg14[%c0_25, %c1_26, %c16] : memref<2x18x288xbf16, #tpu.memory_space<vmem>>, vector<2x16x256xbf16>
    tpu.vector_store %arg14[%c0_25, %c1_26, %c16], %24 {strides = array<i32>} : memref<2x18x288xbf16, #tpu.memory_space<vmem>>, vector<2x16x256xbf16>,
    %c0_27 = arith.constant 0 : index
    %c0_28 = arith.constant 0 : index
    %c0_29 = arith.constant 0 : index
    %26 = vector.load %arg14[%c0_27, %c0_28, %c0_29] : memref<2x18x288xbf16, #tpu.memory_space<vmem>>, vector<2x16x288xbf16>
    %27 = vector.shape_cast %26 : vector<2x16x288xbf16> to vector<32x288xbf16>
    %c0_30 = arith.constant 0 : index
    %c1_31 = arith.constant 1 : index
    %c0_32 = arith.constant 0 : index
    %28 = vector.load %arg14[%c0_30, %c1_31, %c0_32] : memref<2x18x288xbf16, #tpu.memory_space<vmem>>, vector<2x16x288xbf16>
    %29 = vector.shape_cast %28 : vector<2x16x288xbf16> to vector<32x288xbf16>
    %c0_33 = arith.constant 0 : index
    %c2_34 = arith.constant 2 : index
    %c0_35 = arith.constant 0 : index
    %30 = vector.load %arg14[%c0_33, %c2_34, %c0_35] : memref<2x18x288xbf16, #tpu.memory_space<vmem>>, vector<2x16x288xbf16>
    %31 = vector.shape_cast %30 : vector<2x16x288xbf16> to vector<32x288xbf16>
    %32 = tpu.concatenate %27, %29, %31 in 1 : vector<32x288xbf16>, vector<32x288xbf16>, vector<32x288xbf16> -> vector<32x864xbf16>
    %c0_36 = arith.constant 0 : index
    %c0_37 = arith.constant 0 : index
    %33 = vector.load %arg5[%c0_36, %c0_37] : memref<864x256xbf16, #tpu.memory_space<vmem>>, vector<864x256xbf16>
    %cst_38 = arith.constant dense<0.000000e+00> : vector<32x256xf32>
    %34 = tpu.matmul %32, %33, %cst_38 {dimension_numbers = #tpu.dot_dimension_numbers<[1], [0], [0], [1], [0, 0, 1, 1], [], []>} : vector<32x864xbf16>, vector<864x256xbf16>, vector<32x256xf32> -> vector<32x256xf32>
    %c0_39 = arith.constant 0 : index
    %c0_40 = arith.constant 0 : index
    %35 = vector.load %arg6[%c0_39, %c0_40] : memref<1x256xf32, #tpu.memory_space<vmem>>, vector<1x256xf32>
    %36 = vector.broadcast %35 : vector<1x256xf32> to vector<32x256xf32>
    %37 = arith.mulf %34, %36 : vector<32x256xf32>
    %c0_41 = arith.constant 0 : index
    %c0_42 = arith.constant 0 : index
    %38 = vector.load %arg7[%c0_41, %c0_42] : memref<1x256xf32, #tpu.memory_space<vmem>>, vector<1x256xf32>
    %39 = vector.broadcast %38 : vector<1x256xf32> to vector<32x256xf32>
    %40 = arith.addf %37, %39 : vector<32x256xf32>
    %41 = vector.shape_cast %40 : vector<32x256xf32> to vector<2x16x256xf32>
    %cst_43 = arith.constant dense<0.000000e+00> : vector<2x256xf32>
    %42 = vector.multi_reduction <add>, %41, %cst_43 [1] : vector<2x16x256xf32> to vector<2x256xf32>
    %c0_44 = arith.constant 0 : index
    %c0_45 = arith.constant 0 : index
    %43 = vector.load %arg8[%c0_44, %c0_45] : memref<256x16xf32, #tpu.memory_space<vmem>>, vector<256x16xf32>
    %cst_46 = arith.constant dense<0.000000e+00> : vector<2x16xf32>
    %44 = tpu.matmul %42, %43, %cst_46 {dimension_numbers = #tpu.dot_dimension_numbers<[1], [0], [0], [1], [0, 0, 1, 1], [], []>} : vector<2x256xf32>, vector<256x16xf32>, vector<2x16xf32> -> vector<2x16xf32>
    %45 = arith.truncf %44 : vector<2x16xf32> to vector<2x16xbf16>
    %c0_47 = arith.constant 0 : index
    %c0_48 = arith.constant 0 : index
    %46 = vector.load %arg9[%c0_47, %c0_48] : memref<16x4xbf16, #tpu.memory_space<vmem>>, vector<16x4xbf16>
    %cst_49 = arith.constant dense<0.000000e+00> : vector<2x4xf32>
    %47 = tpu.matmul %45, %46, %cst_49 {dimension_numbers = #tpu.dot_dimension_numbers<[1], [0], [0], [1], [0, 0, 1, 1], [], []>} : vector<2x16xbf16>, vector<16x4xbf16>, vector<2x4xf32> -> vector<2x4xf32>
    %c0_50 = arith.constant 0 : index
    %c0_51 = arith.constant 0 : index
    %48 = vector.load %arg10[%c0_50, %c0_51] : memref<1x4xf32, #tpu.memory_space<vmem>>, vector<1x4xf32>
    %49 = vector.broadcast %48 : vector<1x4xf32> to vector<2x4xf32>
    %50 = arith.addf %47, %49 : vector<2x4xf32>
    %cst_52 = arith.constant 0.000000e+00 : f32
    %51 = vector.broadcast %cst_52 : f32 to vector<2x4xf32>
    %52 = arith.maximumf %50, %51 : vector<2x4xf32>
    %53 = arith.truncf %52 : vector<2x4xf32> to vector<2x4xbf16>
    %c0_53 = arith.constant 0 : index
    %c0_54 = arith.constant 0 : index
    %54 = vector.load %arg11[%c0_53, %c0_54] : memref<4x256xbf16, #tpu.memory_space<vmem>>, vector<4x256xbf16>
    %cst_55 = arith.constant dense<0.000000e+00> : vector<2x256xf32>
    %55 = tpu.matmul %53, %54, %cst_55 {dimension_numbers = #tpu.dot_dimension_numbers<[1], [0], [0], [1], [0, 0, 1, 1], [], []>} : vector<2x4xbf16>, vector<4x256xbf16>, vector<2x256xf32> -> vector<2x256xf32>
    %c0_56 = arith.constant 0 : index
    %c0_57 = arith.constant 0 : index
    %56 = vector.load %arg12[%c0_56, %c0_57] : memref<1x256xf32, #tpu.memory_space<vmem>>, vector<1x256xf32>
    %57 = vector.broadcast %56 : vector<1x256xf32> to vector<2x256xf32>
    %58 = arith.addf %55, %57 : vector<2x256xf32>
    %cst_58 = arith.constant 0.000000e+00 : f32
    %59 = vector.broadcast %cst_58 : f32 to vector<2x256xf32>
    %60 = arith.subf %59, %58 : vector<2x256xf32>
    %61 = math.exp %60 : vector<2x256xf32>
    %cst_59 = arith.constant 1.000000e+00 : f32
    %62 = vector.broadcast %cst_59 : f32 to vector<2x256xf32>
    %63 = arith.addf %62, %61 : vector<2x256xf32>
    %64 = tpu.reciprocal %63 {approx = true} : vector<2x256xf32> -> vector<2x256xf32>
    %65 = vector.shape_cast %64 : vector<2x256xf32> to vector<2x1x256xf32>
    %66 = vector.broadcast %65 : vector<2x1x256xf32> to vector<2x16x256xf32>
    %67 = arith.mulf %41, %66 : vector<2x16x256xf32>
    %c0_60 = arith.constant 0 : index
    %c0_61 = arith.constant 0 : index
    %c0_62 = arith.constant 0 : index
    %68 = vector.load %arg1[%c0_60, %c0_61, %c0_62] : memref<2x16x256xf32, #tpu.memory_space<vmem>>, vector<2x16x256xf32>
    %69 = arith.addf %67, %68 : vector<2x16x256xf32>
    %cst_63 = arith.constant 0.000000e+00 : f32
    %70 = vector.broadcast %cst_63 : f32 to vector<2x16x256xf32>
    %71 = arith.maximumf %69, %70 : vector<2x16x256xf32>
    %c0_64 = arith.constant 0 : index
    %c0_65 = arith.constant 0 : index
    %c0_66 = arith.constant 0 : index
    %72 = vector.load %arg13[%c0_64, %c0_65, %c0_66] : memref<2x16x256xf32, #tpu.memory_space<vmem>>, vector<2x16x256xf32>
    tpu.vector_store %arg13[%c0_64, %c0_65, %c0_66], %71 {strides = array<i32>} : memref<2x16x256xf32, #tpu.memory_space<vmem>>, vector<2x16x256xf32>,
    return
  }
}

</mosaic_0001>

<bundles_post_ra>
// kernel: tile.38
= control target key start
LH: loop header
LB: loop body
LE: loop exit
PB: predicated region body
PF: predicated region fallthrough
CT: control target
= control target key end

     0   :  { %s28_s0 = inlined_call_operand.vmem [shape: f32[16], index: 0, kind: input, shape index: {}]   ;;  %s29_s1 = inlined_call_operand.vmem [shape: f32[16,16], index: 1, kind: output, shape index: {}]  }
   0x1   :  { %v4_v0 = vld [vmem:[%s28_s0] ss:$0 sm:$0xff] }
   0x2   :  { %5 = vst [vmem:[%s29_s1] sm:$0xff] %v4_v0  ;;  %8 = vst [vmem:[%s29_s1 + $0x8] sm:$0xff] %v4_v0 }

// kernel: tile.39
= control target key start
LH: loop header
LB: loop body
LE: loop exit
PB: predicated region body
PF: predicated region fallthrough
CT: control target
= control target key end

     0   :  { %s7_s6 = smov 3  ;;  %s21_s9 = smov 3  ;;  %vm4_vm0 = vcmask 130048   ;;  %vm11_vm1 = vcmask 1048448   ;;  %vm18_vm2 = vcmask 917248   ;;  %vm25_vm3 = vcmask 786048   ;;  %s128_s0 = inlined_call_operand.vmem [shape: f32[16,16], index: 0, kind: input, shape index: {}]   ;;  %s129_s1 = inlined_call_operand.vmem [shape: f32[1,256], index: 1, kind: output, shape index: {}]  }
   0x1   :  { %v66_v0 = vld [vmem:[%s128_s0 + $0x7] ss:$8 sm:%s7_s6]   ;;  %s81_s10 = smov 112   ;;  %v68_v1 = vld [vmem:[%s128_s0 + $0x5] ss:$8 sm:%s21_s9]   ;;  %s14_s13 = smov 3 }
   0x2   :  { %9 = vrot.lane.b32.xlu0 %v66_v0, %s81_s10  ;;  %s82_s14 = smov 80   ;;  %v67_v2 = vld [vmem:[%s128_s0 + $0x6] ss:$8 sm:%s14_s13]   ;;  %s28_s17 = smov 3  ;;  %vm32_vm4 = vcmask 654848   ;;  %vm39_vm5 = vcmask 523648  }
   0x3   :  { %23 = vrot.lane.b32.xlu1 %v68_v1, %s82_s14  ;;  %v69_v3 = vld [vmem:[%s128_s0 + $0x4] ss:$8 sm:%s28_s17]   ;;  %s35_s20 = smov 3  ;;  %s42_s21 = smov 3  ;;  %vm46_vm6 = vcmask 392448   ;;  %vm53_vm7 = vcmask 261248  }
   0x4   :  { %s83_s22 = smov 96   ;;  %s84_s23 = smov 64   ;;  %v70_v4 = vld [vmem:[%s128_s0 + $0x3] ss:$8 sm:%s35_s20]   ;;  %v71_v5 = vld [vmem:[%s128_s0 + $0x2] ss:$8 sm:%s42_s21]  }
   0x5   :  { %s2_s26 = smov 3  ;;  %s49_s29 = smov 3 }
   0x6   :  { %16 = vrot.lane.b32.xlu0 %v67_v2, %s83_s22  ;;  %v3_v6 = vld [vmem:[%s128_s0] ss:$8 sm:%s2_s26]   ;;  %s85_s3 = smov 48   ;;  %s86_s4 = smov 32  }
   0x7   :  { %30 = vrot.lane.b32.xlu1 %v69_v3, %s84_s23  ;;  %5 = vst.msk [vmem:[#allocation0] ss:$8 sm:$0x3] %vm4_vm0, %v3_v6   ;;  %v72_v7 = vld [vmem:[%s128_s0 + $0x1] ss:$8 sm:%s49_s29]   ;;  %s87_s0 = smov 16  }
   0xa   :  { %37 = vrot.lane.b32.xlu0 %v70_v4, %s85_s3 }
   0xb   :  { %44 = vrot.lane.b32.xlu1 %v71_v5, %s86_s4 }
   0xe   :  { %51 = vrot.lane.b32.xlu0 %v72_v7, %s87_s0 }
  0x74   :  { %v10_v8 = vpop.permute.xlu0 %9  }
  0x75   :  { %12 = vst.msk [vmem:[#allocation0] ss:$8 sm:$0x3] %vm11_vm1, %v10_v8   ;;  %v24_v9 = vpop.permute.xlu1 %23  }
  0x78   :  { %v17_v10 = vpop.permute.xlu0 %16  }
  0x79   :  { %19 = vst.msk [vmem:[#allocation0] ss:$8 sm:$0x3] %vm18_vm2, %v17_v10   ;;  %v31_v11 = vpop.permute.xlu1 %30  }
  0x7a   :  { %26 = vst.msk [vmem:[#allocation0] ss:$8 sm:$0x3] %vm25_vm3, %v24_v9  }
  0x7b   :  { %33 = vst.msk [vmem:[#allocation0] ss:$8 sm:$0x3] %vm32_vm4, %v31_v11  }
  0x7c   :  { %v38_v12 = vpop.permute.xlu0 %37  }
  0x7d   :  { %40 = vst.msk [vmem:[#allocation0] ss:$8 sm:$0x3] %vm39_vm5, %v38_v12   ;;  %v45_v13 = vpop.permute.xlu1 %44  }
  0x7e   :  { %47 = vst.msk [vmem:[#allocation0] ss:$8 sm:$0x3] %vm46_vm6, %v45_v13  }
  0x80   :  { %v52_v14 = vpop.permute.xlu0 %51  }
  0x81   :  { %54 = vst.msk [vmem:[#allocation0] ss:$8 sm:$0x3] %vm53_vm7, %v52_v14  }
  0x88   :  { %v58_v15 = vld [vmem:[#allocation0] sm:$0x1]  ;;  %v62_v16 = vld [vmem:[#allocation0 + $0x8] sm:$0x1] }
  0x89   :  { %60 = vst [vmem:[%s129_s1] sm:$0x1] %v58_v15  ;;  %73 = vst [vmem:[%s129_s1 + $0x1] sm:$0x1] %v62_v16 }

// kernel: basic_block_se.1
= control target key start
LH: loop header
LB: loop body
LE: loop exit
PB: predicated region body
PF: predicated region fallthrough
CT: control target
= control target key end

     0   :  { %vm57_vm0 = vsmask.f32 3328  ;;  %vm58_vm1 = vsmask.f32 7440  ;;  %vm172_vm2 = vcmask 1042432   ;;  %vm173_vm3 = vcmask 1046532   ;;  %s5203_s2 = inlined_call_operand.vmem [shape: bf16[864,256], index: 2, kind: input, shape index: {}]   ;;  %s5204_s0 = inlined_call_operand.vmem [shape: bf16[2,18,288], index: 0, kind: input, shape index: {}]   ;;  %s5205_s5 = inlined_call_operand.vmem [shape: bf16[864,256], index: 5, kind: input, shape index: {}]   ;;  %s5206_s3 = inlined_call_operand.vmem [shape: f32[1,256], index: 3, kind: input, shape index: {}]   ;;  %s5207_s4 = inlined_call_operand.vmem [shape: f32[1,256], index: 4, kind: input, shape index: {}]   ;;  %s5208_s8 = inlined_call_operand.vmem [shape: f32[256,16], index: 8, kind: input, shape index: {}]   ;;  %s5209_s9 = inlined_call_operand.vmem [shape: bf16[16,4], index: 9, kind: input, shape index: {}]   ;;  %s5210_s6 = inlined_call_operand.vmem [shape: f32[1,256], index: 6, kind: input, shape index: {}]   ;;  %s5211_s7 = inlined_call_operand.vmem [shape: f32[1,256], index: 7, kind: input, shape index: {}]   ;;  %s5212_s11 = inlined_call_operand.vmem [shape: bf16[4,256], index: 11, kind: input, shape index: {}]   ;;  %s5213_s10 = inlined_call_operand.vmem [shape: f32[1,4], index: 10, kind: input, shape index: {}]   ;;  %s5214_s12 = inlined_call_operand.vmem [shape: f32[1,256], index: 12, kind: input, shape index: {}]   ;;  %s5215_s1 = inlined_call_operand.vmem [shape: f32[2,16,256], index: 1, kind: input, shape index: {}]   ;;  %s5216_s13 = inlined_call_operand.vmem [shape: f32[2,16,256], index: 13, kind: output, shape index: {}]  }
   0x1   :  { %v3381_v0 = vld [vmem:[%s5203_s2 + $0x4] ss:$8 sps:$4 sm:$0xff]   ;;  %v3383_v1 = vld [vmem:[%s5203_s2] ss:$8 sps:$4 sm:$0xff]   ;;  %v3384_v2 = vld [vmem:[%s5203_s2 + $0x14] ss:$8 sps:$4 sm:$0xff]  }
   0x2   :  { %976 = vmatprep.subr.bf16.mxu0 %v3381_v0  ;;  %v3386_v3 = vld [vmem:[%s5203_s2 + $0x10] ss:$8 sps:$4 sm:$0xff]   ;;  %v3387_v4 = vld [vmem:[%s5203_s2 + $0x24] ss:$8 sps:$4 sm:$0xff]   ;;  %v3389_v13 = vld [vmem:[%s5203_s2 + $0x20] ss:$8 sps:$4 sm:$0xff]  }
   0x3   :  { %977 = vmatpush1.bf16.msra.mxu0 %v3383_v1  ;;  %v3817_v5 = vld [vmem:[%s5204_s0] sm:$0xff]  ;;  %v3822_v6 = vld [vmem:[%s5204_s0 + $0xc] sm:$0xff]  ;;  %v3827_v7 = vld [vmem:[%s5204_s0 + $0x18] sm:$0x11]  ;;  %s3722_s14 = smov 32   ;;  %s3723_s25 = smov 64  }
   0x4   :  { %978 = vmatprep.subr.bf16.mxu0 %v3384_v2  ;;  %v61_v8 = vshrl.u32 %v3817_v5, 16  ;;  %v64_v9 = vshll.u32 %v3817_v5, 16  ;;  %v70_v10 = vshll.u32 %v3822_v6, 16  ;;  %v88_v11 = vshrl.u32 %v3822_v6, 16  ;;  %v3840_v14 = vld [vmem:[%s5204_s0 + $0x24] sm:$0xff]  ;;  %v3847_v18 = vld [vmem:[%s5204_s0 + $0x30] sm:$0xff]  ;;  %vm3863_vm4 = vmor %vm57_vm0, %vm58_vm1 }
   0x5   :  { %v94_v12 = vshll.u32 %v3827_v7, 16  ;;  %v2978_v15 = vcombine.high %v3817_v5, %v3822_v6  ;;  %v3852_v19 = vld [vmem:[%s5204_s0 + $0x3c] sm:$0x11]  ;;  %v109_v20 = vshrl.u32 %v3840_v14, 16  ;;  %v112_v24 = vshll.u32 %v3840_v14, 16  ;;  %vm3913_vm5 = vmor %vm172_vm2, %vm173_vm3  ;;  %s3725_s15 = smov 16  }
   0x6   :  { %v63_v16 = vrot.slane %v61_v8, 4  ;;  %v66_v17 = vrot.slane %v64_v9, 5  ;;  %v72_v21 = vrot.slane %v70_v10, 5  ;;  %v90_v22 = vrot.slane %v88_v11, 4  ;;  %v3390_v29 = vld [vmem:[%s5203_s2 + $0x34] ss:$8 sps:$4 sm:$0xff]  }
   0x7   :  { %979 = vmatpush1.bf16.msra.mxu0 %v3386_v3  ;;  %v96_v23 = vrot.slane %v94_v12, 5  ;;  %1008 = vmatprep.mubr.bf16.mxu0 %v2978_v15  ;;  %v111_v26 = vrot.slane %v109_v20, 4  ;;  %v118_v27 = vshll.u32 %v3847_v18, 16  ;;  %v136_v28 = vshrl.u32 %v3847_v18, 16  ;;  %v3392_v38 = vld [vmem:[%s5203_s2 + $0x30] ss:$8 sps:$4 sm:$0xff]  }
   0x8   :  { %980 = vmatprep.subr.bf16.mxu0 %v3387_v4  ;;  %v67_v25 = vor.u32 %v66_v17, %v63_v16  ;;  %v91_v31 = vor.u32 %v90_v22, %v72_v21  ;;  %v114_v32 = vrot.slane %v112_v24, 5  ;;  %v142_v33 = vshll.u32 %v3852_v19, 16  ;;  %v3876_v43 = vld [vmem:[%s5204_s0 + $0x8] sm:$0xf]  ;;  %v3881_v44 = vld [vmem:[%s5204_s0 + $0x14] sm:$0xf] }
   0x9   :  { %v177_v34 = vrot.slane %v3822_v6, 5  ;;  %v120_v36 = vrot.slane %v118_v27, 5  ;;  %v138_v37 = vrot.slane %v136_v28, 4  ;;  %v184_v39 = vrot.slane %v3827_v7, 5  ;;  %v3393_v47 = vld [vmem:[%s5203_s2 + $0x44] ss:$8 sps:$4 sm:$0xff]  }
   0xa   :  { %v68_v35 = vrot.slane %v67_v25, 4  ;;  %v92_v40 = vrot.slane %v91_v31, 4  ;;  %v115_v41 = vor.u32 %v114_v32, %v111_v26  ;;  %v144_v42 = vrot.slane %v142_v33, 5  ;;  %v3891_v48 = vld [vmem:[%s5204_s0 + $0x20] sm:$0x1] }
   0xb   :  { %981 = vmatpush1.bf16.msra.mxu0 %v3389_v13  ;;  %v139_v46 = vor.u32 %v138_v37, %v120_v36  ;;  %v75_v49 = vshrl.u32 %v3876_v43, 16  ;;  %v78_v50 = vshll.u32 %v3876_v43, 16  ;;  %v84_v53 = vshll.u32 %v3881_v44, 16  ;;  %v156_v55 = vld [vmem:[%s5204_s0] sm:$0xee] }
   0xc   :  { %v73_v45 = vsel %vm3863_vm4, %v68_v35, %v72_v21  ;;  %982 = vmatprep.subr.bf16.mxu0 %v3390_v29  ;;  %v97_v51 = vsel %vm3863_vm4, %v92_v40, %v96_v23  ;;  %v116_v52 = vrot.slane %v115_v41, 4  ;;  %v98_v54 = vshrl.u32 %v3881_v44, 16  ;;  %v3395_v0 = vld [vmem:[%s5203_s2 + $0x40] ss:$8 sps:$4 sm:$0xff]   ;;  %v3396_v8 = vld [vmem:[%s5203_s2 + $0x54] ss:$8 sps:$4 sm:$0xff]  }
   0xd   :  { %v2983_v56 = vcombine.low %v73_v45, %v97_v51  ;;  %v2984_v57 = vcombine.high %v73_v45, %v97_v51  ;;  %v140_v58 = vrot.slane %v139_v46, 4  ;;  %v77_v59 = vrot.slane %v75_v49, 4  ;;  %v3398_v20 = vld [vmem:[%s5203_s2 + $0x50] ss:$8 sps:$4 sm:$0xff]   ;;  %v3399_v22 = vld [vmem:[%s5203_s2 + $0x64] ss:$8 sps:$4 sm:$0xff]  }
   0xe   :  { %v121_v60 = vsel %vm3863_vm4, %v116_v52, %v120_v36  ;;  %v80_v61 = vrot.slane %v78_v50, 5  ;;  %v86_v62 = vrot.slane %v84_v53, 5  ;;  %v100_v63 = vrot.slane %v98_v54, 4  ;;  %v3401_v29 = vld [vmem:[%s5203_s2 + $0x60] ss:$8 sps:$4 sm:$0xff]  }
   0xf   :  { %983 = vmatpush1.bf16.msra.mxu0 %v3392_v38  ;;  %247 = vrot.lane.b32.xlu0 %v2983_v56, %s3722_s14  ;;  %v145_v1 = vsel %vm3863_vm4, %v140_v58, %v144_v42  ;;  %v104_v2 = vshll.u32 %v3891_v48, 16  ;;  %v2973_v4 = vrot.slane %v156_v55, 9  ;;  %v183_v7 = vrot.slane %v177_v34, 4  ;;  %v3402_v31 = vld [vmem:[%s5203_s2 + $0x74] ss:$8 sps:$4 sm:$0xff]  }
  0x10   :  { %984 = vmatprep.subr.bf16.mxu0 %v3393_v47  ;;  %v2986_v9 = vcombine.low %v121_v60, %v145_v1  ;;  %v81_v10 = vor.u32 %v80_v61, %v77_v59  ;;  %v101_v11 = vor.u32 %v100_v63, %v86_v62  ;;  %v2987_v13 = vcombine.high %v121_v60, %v145_v1  ;;  %v3405_v35 = vld [vmem:[%s5203_s2 + $0x84] ss:$8 sps:$4 sm:$0xff]   ;;  %v3407_v36 = vld [vmem:[%s5203_s2 + $0x80] ss:$8 sps:$4 sm:$0xff]   ;;  %v3408_v37 = vld [vmem:[%s5203_s2 + $0x94] ss:$8 sps:$4 sm:$0xff]  }
  0x11   :  { %v106_v12 = vrot.slane %v104_v2, 5  ;;  %v178_v17 = vsel %vm3913_vm5, %v2973_v4, %v177_v34  ;;  %v185_v21 = vsel %vm3913_vm5, %v183_v7, %v184_v39  ;;  %v2980_v23 = vcombine.low %v3840_v14, %v3847_v18  ;;  %v3404_v34 = vld [vmem:[%s5203_s2 + $0x70] ss:$8 sps:$4 sm:$0xff]   ;;  %v3966_v38 = vld [vmem:[%s5204_s0 + $0x2c] sm:$0xf] }
  0x12   :  { %253 = vrot.lane.b32.xlu1 %v2986_v9, %s3722_s14  ;;  %v82_v15 = vrot.slane %v81_v10, 4  ;;  %v102_v16 = vrot.slane %v101_v11, 4  ;;  %v2979_v24 = vcombine.low %v3876_v43, %v3881_v44  ;;  %v2989_v28 = vcombine.low %v178_v17, %v185_v21  ;;  %v3973_v42 = vld [vmem:[%s5204_s0 + $0x38] sm:$0xf]  ;;  %v56_v45 = vld [vmem:[%s5204_s0 + $0x44] sm:$0x1] }
  0x13   :  { %985 = vmatpush1.bf16.msra.mxu0 %v3395_v0  ;;  %249 = vrot.lane.b32.xlu0 %v2984_v57, %s3722_s14  ;;  %v2990_v32 = vcombine.high %v178_v17, %v185_v21  ;;  %v191_v33 = vrot.slane %v3847_v18, 5  ;;  %v198_v40 = vrot.slane %v3852_v19, 5  ;;  %v181_v41 = vrot.slane %v3881_v44, 5  ;;  %v158_v56 = vld [vmem:[%s5204_s0 + $0x24] sm:$0xee] }
  0x14   :  { %986 = vmatprep.subr.bf16.mxu0 %v3396_v8  ;;  %v87_v25 = vsel %vm3863_vm4, %v82_v15, %v86_v62  ;;  %v107_v26 = vsel %vm3863_vm4, %v102_v16, %v106_v12  ;;  %v123_v46 = vshrl.u32 %v3966_v38, 16  ;;  %v126_v47 = vshll.u32 %v3966_v38, 16  ;;  %v3410_v58 = vld [vmem:[%s5203_s2 + $0x90] ss:$8 sps:$4 sm:$0xff]   ;;  %v157_v4 = vld [vmem:[%s5204_s0 + $0x8] sm:$0xe] }
  0x15   :  { %v2985_v27 = vcombine.low %v87_v25, %v107_v26  ;;  %v197_v39 = vrot.slane %v191_v33, 4  ;;  %v132_v49 = vshll.u32 %v3973_v42, 16  ;;  %v146_v19 = vshrl.u32 %v3973_v42, 16  ;;  %v3413_v11 = vld [vmem:[%s5203_s2 + $0xa0] ss:$8 sps:$4 sm:$0xff]  }
  0x16   :  { %255 = vrot.lane.b32.xlu1 %v2987_v13, %s3722_s14  ;;  %v152_v50 = vshll.u32 %v56_v45, 16  ;;  %v125_v51 = vrot.slane %v123_v46, 4  ;;  %v128_v52 = vrot.slane %v126_v47, 5  ;;  %v187_v53 = vrot.slane %v3891_v48, 5  ;;  %v3411_v48 = vld [vmem:[%s5203_s2 + $0xa4] ss:$8 sps:$4 sm:$0xff]  }
  0x17   :  { %987 = vmatpush1.bf16.msra.mxu0 %v3398_v20  ;;  %251 = vrot.lane.b32.xlu0 %v2985_v27, %s3722_s14  ;;  %v134_v54 = vrot.slane %v132_v49, 5  ;;  %v148_v55 = vrot.slane %v146_v19, 4  ;;  %v186_v57 = vrot.slane %v181_v41, 4  ;;  %v2975_v60 = vrot.slane %v158_v56, 9  ;;  %v3414_v13 = vld [vmem:[%s5203_s2 + $0xb4] ss:$8 sps:$4 sm:$0xff]  }
  0x18   :  { %988 = vmatprep.subr.bf16.mxu0 %v3399_v22  ;;  %v129_v59 = vor.u32 %v128_v52, %v125_v51  ;;  %v199_v61 = vsel %vm3913_vm5, %v197_v39, %v198_v40  ;;  %v154_v63 = vrot.slane %v152_v50, 5  ;;  %v195_v0 = vrot.slane %v3973_v42, 5  ;;  %v159_v25 = vld [vmem:[%s5204_s0 + $0x2c] sm:$0xe]  ;;  %v3416_v27 = vld [vmem:[%s5203_s2 + $0xb0] ss:$8 sps:$4 sm:$0xff]  }
  0x19   :  { %v149_v62 = vor.u32 %v148_v55, %v134_v54  ;;  %v192_v2 = vsel %vm3913_vm5, %v2975_v60, %v191_v33  ;;  %v2974_v9 = vrot.slane %v157_v4, 9  ;;  %v188_v10 = vsel %vm3913_vm5, %v186_v57, %v187_v53  ;;  %v3419_v33 = vld [vmem:[%s5203_s2 + $0xc0] ss:$8 sps:$4 sm:$0xff]   ;;  %v3426_v40 = vld [vmem:[%s5203_s2 + $0xf4] ss:$8 sps:$4 sm:$0xff]  }
  0x1a   :  { %284 = vrot.lane.b32.xlu1 %v2989_v28, %s3723_s25  ;;  %v130_v1 = vrot.slane %v129_v59, 4  ;;  %v2992_v8 = vcombine.low %v192_v2, %v199_v61  ;;  %v200_v17 = vrot.slane %v195_v0, 4  ;;  %v201_v20 = vrot.slane %v56_v45, 5  ;;  %v3425_v39 = vld [vmem:[%s5203_s2 + $0xe0] ss:$8 sps:$4 sm:$0xff]  }
  0x1b   :  { %989 = vmatpush1.bf16.msra.mxu0 %v3401_v29  ;;  %286 = vrot.lane.b32.xlu0 %v2990_v32, %s3723_s25  ;;  %v150_v7 = vrot.slane %v149_v62, 4  ;;  %v182_v16 = vsel %vm3913_vm5, %v2974_v9, %v181_v41  ;;  %v2976_v26 = vrot.slane %v159_v25, 9  ;;  %v2993_v28 = vcombine.high %v192_v2, %v199_v61  ;;  %v3417_v29 = vld [vmem:[%s5203_s2 + $0xc4] ss:$8 sps:$4 sm:$0xff]   ;;  %v3428_v45 = vld [vmem:[%s5203_s2 + $0xf0] ss:$8 sps:$4 sm:$0xff]  }
  0x1c   :  { %990 = vmatprep.subr.bf16.mxu0 %v3402_v31  ;;  %v135_v12 = vsel %vm3863_vm4, %v130_v1, %v134_v54  ;;  %v2991_v22 = vcombine.low %v182_v16, %v188_v10  ;;  %v202_v32 = vsel %vm3913_vm5, %v200_v17, %v201_v20  ;;  %v2982_v41 = vcombine.low %v3966_v38, %v3973_v42  ;;  %v3432_v46 = vld [vmem:[%s5203_s2 + $0x104] ss:$8 sps:$4 sm:$0xff]   ;;  %v3430_v49 = vld [vmem:[%s5203_s2 + $0x100] ss:$8 sps:$4 sm:$0xff]   ;;  %v3436_v50 = vld [vmem:[%s5203_s2 + $0x114] ss:$8 sps:$4 sm:$0xff]  }
  0x1d   :  { %v155_v15 = vsel %vm3863_vm4, %v150_v7, %v154_v63  ;;  %v196_v31 = vsel %vm3913_vm5, %v2976_v26, %v195_v0  ;;  %v2977_v47 = vcombine.low %v3817_v5, %v3822_v6  ;;  %v2981_v19 = vcombine.high %v3840_v14, %v3847_v18  ;;  %v3434_v51 = vld [vmem:[%s5203_s2 + $0x110] ss:$8 sps:$4 sm:$0xff]   ;;  %v3439_v5 = vld [vmem:[%s5203_s2 + $0x124] ss:$8 sps:$4 sm:$0xff]   ;;  %v3437_v6 = vld [vmem:[%s5203_s2 + $0x120] ss:$8 sps:$4 sm:$0xff]  }
  0x1e   :  { %v2988_v21 = vcombine.low %v135_v12, %v155_v15  ;;  %v3442_v52 = vld [vmem:[%s5203_s2 + $0x134] ss:$8 sps:$4 sm:$0xff]   ;;  %v3440_v53 = vld [vmem:[%s5203_s2 + $0x130] ss:$8 sps:$4 sm:$0xff]   ;;  %v3445_v54 = vld [vmem:[%s5203_s2 + $0x144] ss:$8 sps:$4 sm:$0xff]  }
  0x1f   :  { %991 = vmatpush1.bf16.msra.mxu0 %v3404_v34  ;;  %290 = vrot.lane.b32.xlu0 %v2992_v8, %s3723_s25  ;;  %v2994_v34 = vcombine.low %v196_v31, %v202_v32  ;;  %v3443_v55 = vld [vmem:[%s5203_s2 + $0x140] ss:$8 sps:$4 sm:$0xff]   ;;  %v3448_v14 = vld [vmem:[%s5203_s2 + $0x154] ss:$8 sps:$4 sm:$0xff]   ;;  %v3446_v18 = vld [vmem:[%s5203_s2 + $0x150] ss:$8 sps:$4 sm:$0xff]  }
  0x20   :  { %992 = vmatprep.subr.bf16.mxu0 %v3405_v35  ;;  %257 = vrot.lane.b32.xlu1 %v2988_v21, %s3722_s14  ;;  %v3420_v35 = vld [vmem:[%s5203_s2 + $0xd4] ss:$8 sps:$4 sm:$0xff]   ;;  %v3449_v56 = vld [vmem:[%s5203_s2 + $0x160] ss:$8 sps:$4 sm:$0xff]   ;;  %v3457_v59 = vld [vmem:[%s5203_s2 + $0x184] ss:$8 sps:$4 sm:$0xff]  }
  0x21   :  { %v3454_v57 = vld [vmem:[%s5203_s2 + $0x174] ss:$8 sps:$4 sm:$0xff]   ;;  %v3455_v60 = vld [vmem:[%s5203_s2 + $0x180] ss:$8 sps:$4 sm:$0xff]   ;;  %v3463_v62 = vld [vmem:[%s5203_s2 + $0x1a4] ss:$8 sps:$4 sm:$0xff]  }
  0x22   :  { %v3460_v61 = vld [vmem:[%s5203_s2 + $0x194] ss:$8 sps:$4 sm:$0xff]   ;;  %v3461_v63 = vld [vmem:[%s5203_s2 + $0x1a0] ss:$8 sps:$4 sm:$0xff]   ;;  %v3464_v1 = vld [vmem:[%s5203_s2 + $0x1b0] ss:$8 sps:$4 sm:$0xff]  }
  0x23   :  { %993 = vmatpush1.bf16.msra.mxu0 %v3407_v36  ;;  %288 = vrot.lane.b32.xlu0 %v2991_v22, %s3723_s25  ;;  %v3422_v36 = vld [vmem:[%s5203_s2 + $0xd0] ss:$8 sps:$4 sm:$0xff]   ;;  %v3466_v0 = vld [vmem:[%s5203_s2 + $0x1b4] ss:$8 sps:$4 sm:$0xff]   ;;  %v3469_v2 = vld [vmem:[%s5203_s2 + $0x1c4] ss:$8 sps:$4 sm:$0xff]  }
  0x24   :  { %994 = vmatprep.subr.bf16.mxu0 %v3408_v37  ;;  %292 = vrot.lane.b32.xlu1 %v2993_v28, %s3723_s25  ;;  %v3423_v37 = vld [vmem:[%s5203_s2 + $0xe4] ss:$8 sps:$4 sm:$0xff]   ;;  %v3467_v4 = vld [vmem:[%s5203_s2 + $0x1c0] ss:$8 sps:$4 sm:$0xff]   ;;  %v3472_v7 = vld [vmem:[%s5203_s2 + $0x1d4] ss:$8 sps:$4 sm:$0xff]  }
  0x25   :  { %v3470_v8 = vld [vmem:[%s5203_s2 + $0x1d0] ss:$8 sps:$4 sm:$0xff]   ;;  %v3476_v9 = vld [vmem:[%s5203_s2 + $0x1e4] ss:$8 sps:$4 sm:$0xff]   ;;  %v3474_v10 = vld [vmem:[%s5203_s2 + $0x1e0] ss:$8 sps:$4 sm:$0xff]  }
  0x26   :  { %v3479_v12 = vld [vmem:[%s5203_s2 + $0x1f0] ss:$8 sps:$4 sm:$0xff]   ;;  %vm5219_vm6 = vcmask 261120   ;;  %v3482_v20 = vld [vmem:[%s5203_s2 + $0x200] ss:$8 sps:$4 sm:$0xff]   ;;  %vm5218_vm7 = vcmask 523264  }
  0x27   :  { %995 = vmatpush1.bf16.msra.mxu0 %v3410_v58  ;;  %v3452_v58 = vld [vmem:[%s5203_s2 + $0x170] ss:$8 sps:$4 sm:$0xff]   ;;  %v3487_v22 = vld [vmem:[%s5203_s2 + $0x214] ss:$8 sps:$4 sm:$0xff]   ;;  %v3490_v43 = vld [vmem:[%s5203_s2 + $0x224] ss:$8 sps:$4 sm:$0xff]  }
  0x28   :  { %996 = vmatprep.subr.bf16.mxu0 %v3411_v48  ;;  %294 = vrot.lane.b32.xlu1 %v2994_v34, %s3723_s25  ;;  %v3458_v48 = vld [vmem:[%s5203_s2 + $0x190] ss:$8 sps:$4 sm:$0xff]   ;;  %v3496_v38 = vld [vmem:[%s5203_s2 + $0x244] ss:$8 sps:$4 sm:$0xff]   ;;  %v3494_v42 = vld [vmem:[%s5203_s2 + $0x240] ss:$8 sps:$4 sm:$0xff]  }
  0x29   :  { %v3485_v28 = vld [vmem:[%s5203_s2 + $0x210] ss:$8 sps:$4 sm:$0xff]   ;;  %vm5217_vm8 = vcmask 785408   ;;  %vm5220_vm9 = vcmask 125952   ;;  %vm1283_vm10 = vcmask 257152   ;;  %vm1236_vm11 = vcmask 1040384  }
  0x2a   :  { %vm1237_vm12 = vsmask.f32 256  ;;  %vm1239_vm13 = vcmask 1044484   ;;  %vm1240_vm14 = vsmask.f32 4352  ;;  %vm1246_vm0 = vcmask 253952  }
  0x2b   :  { %997 = vmatpush1.bf16.msra.mxu0 %v3413_v11  ;;  %v3481_v11 = vld [vmem:[%s5203_s2 + $0x1f4] ss:$8 sps:$4 sm:$0xff]   ;;  %vm4374_vm15 = vmand %vm1236_vm11, %vm1237_vm12  ;;  %vm1257_vm2 = vsmask.f32 7938  ;;  %v3624_v3 = vld [vmem:[%s5205_s5 + $0x190] ss:$8 sps:$4 sm:$0xff]  }
  0x2c   :  { %998 = vmatprep.subr.bf16.mxu0 %v3414_v13  ;;  %v3484_v13 = vld [vmem:[%s5203_s2 + $0x204] ss:$8 sps:$4 sm:$0xff]   ;;  %vm4382_vm1 = vmand %vm1239_vm13, %vm1240_vm14  ;;  %v3620_v30 = vld [vmem:[%s5205_s5 + $0x174] ss:$8 sps:$4 sm:$0xff]  }
  0x2d   :  { %vm1242_vm3 = vmor %vm4382_vm1, %vm4374_vm15 }
  0x2e   :  { %vm4395_vm14 = vmand %vm1246_vm0, %vm1237_vm12 }
  0x2f   :  { %999 = vmatpush1.bf16.msra.mxu0 %v3416_v27  ;;  %vm1258_vm15 = vmand %vm1236_vm11, %vm1257_vm2 }
  0x30   :  { %1000 = vmatprep.subr.bf16.mxu0 %v3417_v29 }
  0x33   :  { %1001 = vmatpush1.bf16.msra.mxu0 %v3419_v33  ;;  %v3493_v33 = vld [vmem:[%s5203_s2 + $0x234] ss:$8 sps:$4 sm:$0xff]  }
  0x34   :  { %1002 = vmatprep.subr.bf16.mxu0 %v3420_v35  ;;  %v3491_v35 = vld [vmem:[%s5203_s2 + $0x230] ss:$8 sps:$4 sm:$0xff]  }
  0x37   :  { %1003 = vmatpush1.bf16.msra.mxu0 %v3422_v36  ;;  %v3499_v36 = vld [vmem:[%s5203_s2 + $0x254] ss:$8 sps:$4 sm:$0xff]  }
  0x38   :  { %1004 = vmatprep.subr.bf16.mxu0 %v3423_v37  ;;  %v3497_v37 = vld [vmem:[%s5203_s2 + $0x250] ss:$8 sps:$4 sm:$0xff]  }
  0x3b   :  { %1005 = vmatpush1.bf16.msra.mxu0 %v3425_v39  ;;  %v3502_v39 = vld [vmem:[%s5203_s2 + $0x264] ss:$8 sps:$4 sm:$0xff]  }
  0x3c   :  { %1006 = vmatprep.subr.bf16.mxu0 %v3426_v40  ;;  %v3500_v40 = vld [vmem:[%s5203_s2 + $0x260] ss:$8 sps:$4 sm:$0xff]  }
  0x3f   :  { %1007 = vmatpush1.bf16.msra.mxu0 %v3428_v45  ;;  %v3503_v45 = vld [vmem:[%s5203_s2 + $0x270] ss:$8 sps:$4 sm:$0xff]  }
  0x40   :  { %1029 = vmatprep.subr.bf16.mxu0 %v3432_v46  ;;  %v3508_v46 = vld [vmem:[%s5203_s2 + $0x284] ss:$8 sps:$4 sm:$0xff]  }
  0x42   :  { %1009 = vmatmul.mubr.bf16.vlgmr.msra.gmra.mrb[0].mxu0 %v2977_v47  ;;  %v3506_v47 = vld [vmem:[%s5203_s2 + $0x280] ss:$8 sps:$4 sm:$0xff]  }
  0x43   :  { %1030 = vmatpush1.bf16.msra.mxu0 %v3430_v49  ;;  %1018 = vmatprep.mubr.bf16.mxu0 %v2981_v19  ;;  %v3511_v49 = vld [vmem:[%s5203_s2 + $0x294] ss:$8 sps:$4 sm:$0xff]   ;;  %v3509_v19 = vld [vmem:[%s5203_s2 + $0x290] ss:$8 sps:$4 sm:$0xff]  }
  0x44   :  { %1031 = vmatprep.subr.bf16.mxu0 %v3436_v50  ;;  %v3514_v50 = vld [vmem:[%s5203_s2 + $0x2a4] ss:$8 sps:$4 sm:$0xff]  }
  0x47   :  { %1032 = vmatpush1.bf16.msra.mxu0 %v3434_v51  ;;  %v3512_v51 = vld [vmem:[%s5203_s2 + $0x2a0] ss:$8 sps:$4 sm:$0xff]  }
  0x48   :  { %1033 = vmatprep.subr.bf16.mxu0 %v3439_v5  ;;  %v3517_v5 = vld [vmem:[%s5203_s2 + $0x2b4] ss:$8 sps:$4 sm:$0xff]  }
  0x4a   :  { %1019 = vmatmul.mubr.bf16.gmra.mrb[4].mxu0 %v2980_v23  ;;  %v3451_v23 = vld [vmem:[%s5203_s2 + $0x164] ss:$8 sps:$4 sm:$0xff]  }
  0x4b   :  { %1034 = vmatpush1.bf16.msra.mxu0 %v3437_v6  ;;  %v3515_v6 = vld [vmem:[%s5203_s2 + $0x2b0] ss:$8 sps:$4 sm:$0xff]  }
  0x4c   :  { %1035 = vmatprep.subr.bf16.mxu0 %v3442_v52  ;;  %v3520_v52 = vld [vmem:[%s5203_s2 + $0x2c4] ss:$8 sps:$4 sm:$0xff]  }
  0x4f   :  { %1036 = vmatpush1.bf16.msra.mxu0 %v3440_v53  ;;  %v3518_v53 = vld [vmem:[%s5203_s2 + $0x2c0] ss:$8 sps:$4 sm:$0xff]  }
  0x50   :  { %1037 = vmatprep.subr.bf16.mxu0 %v3445_v54  ;;  %v3524_v54 = vld [vmem:[%s5203_s2 + $0x2d4] ss:$8 sps:$4 sm:$0xff]  }
  0x53   :  { %1038 = vmatpush1.bf16.msra.mxu0 %v3443_v55  ;;  %v3522_v55 = vld [vmem:[%s5203_s2 + $0x2d0] ss:$8 sps:$4 sm:$0xff]  }
  0x54   :  { %1039 = vmatprep.subr.bf16.mxu0 %v3448_v14  ;;  %v3527_v14 = vld [vmem:[%s5203_s2 + $0x2e4] ss:$8 sps:$4 sm:$0xff]  }
  0x57   :  { %1040 = vmatpush1.bf16.msra.mxu0 %v3446_v18  ;;  %v3525_v18 = vld [vmem:[%s5203_s2 + $0x2e0] ss:$8 sps:$4 sm:$0xff]  }
  0x58   :  { %1041 = vmatprep.subr.bf16.mxu0 %v3451_v23  ;;  %v3530_v23 = vld [vmem:[%s5203_s2 + $0x2f4] ss:$8 sps:$4 sm:$0xff]  }
  0x5b   :  { %1042 = vmatpush1.bf16.msra.mxu0 %v3449_v56 }
  0x5c   :  { %1043 = vmatprep.subr.bf16.mxu0 %v3454_v57  ;;  %v3528_v57 = vld [vmem:[%s5203_s2 + $0x2f0] ss:$8 sps:$4 sm:$0xff]  }
  0x5f   :  { %1044 = vmatpush1.bf16.msra.mxu0 %v3452_v58  ;;  %v3533_v58 = vld [vmem:[%s5203_s2 + $0x304] ss:$8 sps:$4 sm:$0xff]  }
  0x60   :  { %1045 = vmatprep.subr.bf16.mxu0 %v3457_v59 }
  0x63   :  { %1046 = vmatpush1.bf16.msra.mxu0 %v3455_v60 }
  0x64   :  { %1047 = vmatprep.subr.bf16.mxu0 %v3460_v61 }
  0x67   :  { %1048 = vmatpush1.bf16.msra.mxu0 %v3458_v48  ;;  %v3531_v48 = vld [vmem:[%s5203_s2 + $0x300] ss:$8 sps:$4 sm:$0xff]  }
  0x68   :  { %1049 = vmatprep.subr.bf16.mxu0 %v3463_v62  ;;  %v3536_v62 = vld [vmem:[%s5203_s2 + $0x314] ss:$8 sps:$4 sm:$0xff]  }
  0x6b   :  { %1050 = vmatpush1.bf16.msra.mxu0 %v3461_v63 }
  0x6c   :  { %1051 = vmatprep.subr.bf16.mxu0 %v3466_v0 }
  0x6f   :  { %1052 = vmatpush1.bf16.msra.mxu0 %v3464_v1  ;;  %v3534_v1 = vld [vmem:[%s5203_s2 + $0x310] ss:$8 sps:$4 sm:$0xff]  }
  0x70   :  { %1053 = vmatprep.subr.bf16.mxu0 %v3469_v2  ;;  %v3539_v2 = vld [vmem:[%s5203_s2 + $0x324] ss:$8 sps:$4 sm:$0xff]  }
  0x73   :  { %1054 = vmatpush1.bf16.msra.mxu0 %v3467_v4 }
  0x74   :  { %1055 = vmatprep.subr.bf16.mxu0 %v3472_v7  ;;  %v3537_v7 = vld [vmem:[%s5203_s2 + $0x320] ss:$8 sps:$4 sm:$0xff]  }
  0x77   :  { %1056 = vmatpush1.bf16.msra.mxu0 %v3470_v8  ;;  %v3542_v8 = vld [vmem:[%s5203_s2 + $0x334] ss:$8 sps:$4 sm:$0xff]  }
  0x78   :  { %1057 = vmatprep.subr.bf16.mxu0 %v3476_v9 }
  0x7b   :  { %1058 = vmatpush1.bf16.msra.mxu0 %v3474_v10  ;;  %v3540_v10 = vld [vmem:[%s5203_s2 + $0x330] ss:$8 sps:$4 sm:$0xff]  }
  0x7c   :  { %1059 = vmatprep.subr.bf16.mxu0 %v3481_v11  ;;  %v3724_v11 = vmov 0  }
  0x7d   :  { %1277 = vst.msk [vmem:[#allocation2 + $0xc] sm:$0xf] %vm5220_vm9, %v3724_v11  ;;  %1281 = vst.msk [vmem:[#allocation2 + $0x30] sm:$0xf] %vm5220_vm9, %v3724_v11 }
  0x7e   :  { %1285 = vst.msk [vmem:[#allocation2 + $0x14] sm:$0xf] %vm1283_vm10, %v3724_v11  ;;  %1289 = vst.msk [vmem:[#allocation2 + $0x38] sm:$0xf] %vm1283_vm10, %v3724_v11 }
  0x7f   :  { %1060 = vmatpush1.bf16.msra.mxu0 %v3479_v12  ;;  %v3545_v12 = vld [vmem:[%s5203_s2 + $0x344] ss:$8 sps:$4 sm:$0xff]  }
  0x80   :  { %1082 = vmatprep.subr.bf16.mxu0 %v3484_v13  ;;  %v3543_v13 = vld [vmem:[%s5203_s2 + $0x340] ss:$8 sps:$4 sm:$0xff]  }
  0x81   :  { %v248_v15 = vpop.permute.xlu0 %247 }
  0x82   :  { %v306_v25 = vsel %vm5219_vm6, %v2979_v24, %v248_v15  ;;  %v3488_v24 = vld [vmem:[%s5203_s2 + $0x220] ss:$8 sps:$4 sm:$0xff]  }
  0x84   :  { %v254_v16 = vpop.permute.xlu1 %253 }
  0x85   :  { %v4161_v17 = vpop.permute.xlu0 %249  ;;  %v310_v32 = vsel %vm5219_vm6, %v2982_v41, %v254_v16  ;;  %v3505_v41 = vld [vmem:[%s5203_s2 + $0x274] ss:$8 sps:$4 sm:$0xff]  }
  0x86   :  { %v260_v21 = vsel %vm5219_vm6, %v248_v15, %v4161_v17  ;;  %v3548_v15 = vld [vmem:[%s5203_s2 + $0x354] ss:$8 sps:$4 sm:$0xff]  }
  0x87   :  { %1061 = vmatprep.mubr.bf16.mxu0 %v260_v21 }
  0x88   :  { %v4175_v26 = vpop.permute.xlu1 %255  ;;  %1062 = vmatmul.mubr.bf16.vlgmr.msra.gmra.mrb[0].mxu0 %v306_v25  ;;  %v3549_v25 = vld [vmem:[%s5205_s5 + $0x4] ss:$8 sps:$4 sm:$0xff]  }
  0x89   :  { %1083 = vmatpush1.bf16.msra.mxu0 %v3482_v20  ;;  %v4177_v27 = vpop.permute.xlu0 %251  ;;  %v262_v29 = vsel %vm5219_vm6, %v254_v16, %v4175_v26  ;;  %v3546_v16 = vld [vmem:[%s5203_s2 + $0x350] ss:$8 sps:$4 sm:$0xff]   ;;  %2347 = vmatprep.subr.bf16.mxu1 %v3549_v25  ;;  %v1254_v25 = vld [vmem:[#allocation2 + $0x2c] sm:$0x1] }
  0x8a   :  { %1084 = vmatprep.subr.bf16.mxu0 %v3487_v22  ;;  %1071 = vmatprep.mubr.bf16.mxu0 %v262_v29  ;;  %v261_v60 = vsel %vm5219_vm6, %v4161_v17, %v4177_v27  ;;  %v3552_v27 = vld [vmem:[%s5205_s5 + $0x14] ss:$8 sps:$4 sm:$0xff]   ;;  %v3555_v29 = vld [vmem:[%s5205_s5 + $0x24] ss:$8 sps:$4 sm:$0xff]  }
  0x8c   :  { %v4187_v44 = vpop.permute.xlu1 %284 }
  0x8d   :  { %1085 = vmatpush1.bf16.msra.mxu0 %v3485_v28  ;;  %v4192_v31 = vpop.permute.xlu0 %286  ;;  %v315_v0 = vsel %vm5218_vm7, %v261_v60, %v4187_v44  ;;  %v3554_v28 = vld [vmem:[%s5205_s5 + $0x10] ss:$8 sps:$4 sm:$0xff]   ;;  %v1190_v60 = vlaneseq }
  0x8e   :  { %1086 = vmatprep.subr.bf16.mxu0 %v3490_v43  ;;  %v297_v34 = vsel %vm5218_vm7, %v4187_v44, %v4192_v31  ;;  %v3557_v43 = vld [vmem:[%s5205_s5 + $0x20] ss:$8 sps:$4 sm:$0xff]   ;;  %v3558_v44 = vld [vmem:[%s5205_s5 + $0x34] ss:$8 sps:$4 sm:$0xff]  }
  0x90   :  { %1072 = vmatmul.mubr.bf16.gmra.mrb[4].mxu0 %v310_v32  ;;  %v3563_v32 = vld [vmem:[%s5205_s5 + $0x40] ss:$8 sps:$4 sm:$0xff]  }
  0x91   :  { %1087 = vmatpush1.bf16.msra.mxu0 %v3488_v24  ;;  %1114 = vmatprep.mubr.bf16.mxu0 %v297_v34  ;;  %v291_v61 = vpop.permute.xlu0 %290  ;;  %v3560_v24 = vld [vmem:[%s5205_s5 + $0x30] ss:$8 sps:$4 sm:$0xff]   ;;  %v3564_v34 = vld [vmem:[%s5205_s5 + $0x54] ss:$8 sps:$4 sm:$0xff]  }
  0x92   :  { %1088 = vmatprep.subr.bf16.mxu0 %v3493_v33  ;;  %v258_v56 = vpop.permute.xlu1 %257  ;;  %v1243_v33 = vld [vmem:[#allocation2] sm:$0x11] }
  0x93   :  { %v263_v4 = vsel %vm5219_vm6, %v4175_v26, %v258_v56  ;;  %v3551_v26 = vld [vmem:[%s5205_s5] ss:$8 sps:$4 sm:$0xff]   ;;  %vm1386_vm6 = vcmask 1047556   ;;  %v3579_v56 = vld [vmem:[%s5205_s5 + $0xa4] ss:$8 sps:$4 sm:$0xff]  }
  0x94   :  { %v319_v9 = vsel %vm5218_vm7, %v263_v4, %v291_v61  ;;  %2348 = vmatpush1.bf16.msra.mxu1 %v3551_v26 }
  0x95   :  { %1089 = vmatpush1.bf16.msra.mxu0 %v3491_v35  ;;  %v289_v17 = vpop.permute.xlu0 %288  ;;  %2349 = vmatprep.subr.bf16.mxu1 %v3552_v27 }
  0x96   :  { %1090 = vmatprep.subr.bf16.mxu0 %v3496_v38  ;;  %v293_v59 = vpop.permute.xlu1 %292  ;;  %v298_v20 = vsel %vm5218_vm7, %v4192_v31, %v289_v17  ;;  %v3561_v31 = vld [vmem:[%s5205_s5 + $0x44] ss:$8 sps:$4 sm:$0xff]  }
  0x97   :  { %v299_v63 = vsel %vm5218_vm7, %v291_v61, %v293_v59  ;;  %v1251_v38 = vld [vmem:[#allocation2 + $0x24] sm:$0x11]  ;;  %v4466_v61 = vshrl.u32 %v1190_v60, 7 }
  0x98   :  { %2350 = vmatpush1.bf16.msra.mxu1 %v3554_v28  ;;  %v3587_v28 = vld [vmem:[%s5205_s5 + $0xc0] ss:$8 sps:$4 sm:$0xff]  }
  0x99   :  { %1091 = vmatpush1.bf16.msra.mxu0 %v3494_v42  ;;  %2351 = vmatprep.subr.bf16.mxu1 %v3555_v29  ;;  %v3566_v42 = vld [vmem:[%s5205_s5 + $0x50] ss:$8 sps:$4 sm:$0xff]   ;;  %v1255_v29 = vsel %vm4395_vm14, 0, %v1254_v25 }
  0x9a   :  { %1092 = vmatprep.subr.bf16.mxu0 %v3499_v36  ;;  %v295_v21 = vpop.permute.xlu1 %294  ;;  %1256 = vst [vmem:[#allocation2 + $0x2c] sm:$0x1] %v1255_v29 }
  0x9b   :  { %v300_v22 = vsel %vm5218_vm7, %v293_v59, %v295_v21  ;;  %v3584_v59 = vld [vmem:[%s5205_s5 + $0xb0] ss:$8 sps:$4 sm:$0xff]   ;;  %1288 = vst.msk [vmem:[#allocation2 + $0x2c] sm:$0xf] %vm1283_vm10, %v3724_v11 }
  0x9c   :  { %2352 = vmatpush1.bf16.msra.mxu1 %v3557_v43 }
  0x9d   :  { %1093 = vmatpush1.bf16.msra.mxu0 %v3497_v37  ;;  %2353 = vmatprep.subr.bf16.mxu1 %v3558_v44  ;;  %v1248_v37 = vld [vmem:[#allocation2 + $0x8] sm:$0x1] }
  0x9e   :  { %1094 = vmatprep.subr.bf16.mxu0 %v3502_v39  ;;  %v3567_v39 = vld [vmem:[%s5205_s5 + $0x64] ss:$8 sps:$4 sm:$0xff]  }
  0xa0   :  { %2354 = vmatpush1.bf16.msra.mxu1 %v3560_v24 }
  0xa1   :  { %1095 = vmatpush1.bf16.msra.mxu0 %v3500_v40  ;;  %2355 = vmatprep.subr.bf16.mxu1 %v3561_v31  ;;  %v1262_v40 = vld [vmem:[#allocation2 + $0x18] sm:$0x11] }
  0xa2   :  { %1096 = vmatprep.subr.bf16.mxu0 %v3505_v41  ;;  %v1269_v41 = vld [vmem:[#allocation2 + $0x3c] sm:$0x11] }
  0xa4   :  { %2356 = vmatpush1.bf16.msra.mxu1 %v3563_v32 }
  0xa5   :  { %1097 = vmatpush1.bf16.msra.mxu0 %v3503_v45  ;;  %v1244_v45 = vsel %vm1242_vm3, 0, %v1243_v33  ;;  %2357 = vmatprep.subr.bf16.mxu1 %v3564_v34  ;;  %v3588_v33 = vld [vmem:[%s5205_s5 + $0xd4] ss:$8 sps:$4 sm:$0xff]   ;;  %v1272_v34 = vld [vmem:[#allocation2 + $0x44] sm:$0x1] }
  0xa6   :  { %1098 = vmatprep.subr.bf16.mxu0 %v3508_v46  ;;  %1245 = vst [vmem:[#allocation2] sm:$0x11] %v1244_v45 }
  0xa7   :  { %1276 = vst.msk [vmem:[#allocation2] sm:$0xf] %vm5220_vm9, %v3724_v11 }
  0xa8   :  { %2358 = vmatpush1.bf16.msra.mxu1 %v3566_v42 }
  0xa9   :  { %1099 = vmatpush1.bf16.msra.mxu0 %v3506_v47  ;;  %v1252_v47 = vsel %vm1242_vm3, 0, %v1251_v38  ;;  %vm1384_vm3 = vcmask 1043584   ;;  %2359 = vmatprep.subr.bf16.mxu1 %v3567_v39 }
  0xaa   :  { %1100 = vmatprep.subr.bf16.mxu0 %v3511_v49  ;;  %v1249_v49 = vsel %vm4395_vm14, 0, %v1248_v37  ;;  %1253 = vst [vmem:[#allocation2 + $0x24] sm:$0x11] %v1252_v47  ;;  %v3590_v37 = vld [vmem:[%s5205_s5 + $0xd0] ss:$8 sps:$4 sm:$0xff]  }
  0xab   :  { %1250 = vst [vmem:[#allocation2 + $0x8] sm:$0x1] %v1249_v49  ;;  %1280 = vst.msk [vmem:[#allocation2 + $0x24] sm:$0xf] %vm5220_vm9, %v3724_v11 }
  0xac   :  { %1284 = vst.msk [vmem:[#allocation2 + $0x8] sm:$0xf] %vm1283_vm10, %v3724_v11  ;;  %vm4425_vm9 = vmand %vm1384_vm3, %vm1257_vm2  ;;  %vm1311_vm10 = vsmask.f32 4368 }
  0xad   :  { %1101 = vmatpush1.bf16.msra.mxu0 %v3509_v19  ;;  %v3569_v19 = vld [vmem:[%s5205_s5 + $0x60] ss:$8 sps:$4 sm:$0xff]   ;;  %vm4525_vm14 = vmor %vm1237_vm12, %vm1311_vm10 }
  0xae   :  { %1102 = vmatprep.subr.bf16.mxu0 %v3514_v50  ;;  %v3570_v50 = vld [vmem:[%s5205_s5 + $0x74] ss:$8 sps:$4 sm:$0xff]   ;;  %2360 = vmatpush1.bf16.msra.mxu1 %v3569_v19 }
  0xaf   :  { %2361 = vmatprep.subr.bf16.mxu1 %v3570_v50 }
  0xb1   :  { %1103 = vmatpush1.bf16.msra.mxu0 %v3512_v51 }
  0xb2   :  { %1104 = vmatprep.subr.bf16.mxu0 %v3517_v5  ;;  %v3591_v5 = vld [vmem:[%s5205_s5 + $0xe4] ss:$8 sps:$4 sm:$0xff]  }
  0xb5   :  { %1105 = vmatpush1.bf16.msra.mxu0 %v3515_v6 }
  0xb6   :  { %1106 = vmatprep.subr.bf16.mxu0 %v3520_v52 }
  0xb9   :  { %1107 = vmatpush1.bf16.msra.mxu0 %v3518_v53 }
  0xba   :  { %1108 = vmatprep.subr.bf16.mxu0 %v3524_v54  ;;  %v3572_v54 = vld [vmem:[%s5205_s5 + $0x70] ss:$8 sps:$4 sm:$0xff]  }
  0xbb   :  { %2362 = vmatpush1.bf16.msra.mxu1 %v3572_v54 }
  0xbd   :  { %1109 = vmatpush1.bf16.msra.mxu0 %v3522_v55  ;;  %v3573_v55 = vld [vmem:[%s5205_s5 + $0x84] ss:$8 sps:$4 sm:$0xff]  }
  0xbe   :  { %1110 = vmatprep.subr.bf16.mxu0 %v3527_v14  ;;  %v3575_v14 = vld [vmem:[%s5205_s5 + $0x80] ss:$8 sps:$4 sm:$0xff]   ;;  %2363 = vmatprep.subr.bf16.mxu1 %v3573_v55 }
  0xbf   :  { %2364 = vmatpush1.bf16.msra.mxu1 %v3575_v14  ;;  %v3593_v14 = vld [vmem:[%s5205_s5 + $0xe0] ss:$8 sps:$4 sm:$0xff]  }
  0xc1   :  { %1111 = vmatpush1.bf16.msra.mxu0 %v3525_v18  ;;  %v3576_v18 = vld [vmem:[%s5205_s5 + $0x94] ss:$8 sps:$4 sm:$0xff]  }
  0xc2   :  { %1112 = vmatprep.subr.bf16.mxu0 %v3530_v23  ;;  %v3578_v23 = vld [vmem:[%s5205_s5 + $0x90] ss:$8 sps:$4 sm:$0xff]   ;;  %2365 = vmatprep.subr.bf16.mxu1 %v3576_v18 }
  0xc3   :  { %2366 = vmatpush1.bf16.msra.mxu1 %v3578_v23 }
  0xc4   :  { %2367 = vmatprep.subr.bf16.mxu1 %v3579_v56 }
  0xc5   :  { %1113 = vmatpush1.bf16.msra.mxu0 %v3528_v57  ;;  %v3581_v57 = vld [vmem:[%s5205_s5 + $0xa0] ss:$8 sps:$4 sm:$0xff]  }
  0xc6   :  { %1135 = vmatprep.subr.bf16.mxu0 %v3533_v58  ;;  %v3582_v58 = vld [vmem:[%s5205_s5 + $0xb4] ss:$8 sps:$4 sm:$0xff]  }
  0xc7   :  { %2368 = vmatpush1.bf16.msra.mxu1 %v3581_v57 }
  0xc8   :  { %1115 = vmatmul.mubr.bf16.vlgmr.msra.gmra.mrb[0].mxu0 %v315_v0  ;;  %2369 = vmatprep.subr.bf16.mxu1 %v3582_v58  ;;  %v1208_v0 = vld [vmem:[%s5207_s4] sm:$0x3] }
  0xc9   :  { %1136 = vmatpush1.bf16.msra.mxu0 %v3531_v48  ;;  %1124 = vmatprep.mubr.bf16.mxu0 %v299_v63  ;;  %v4469_v48 = vsub.s32 0, %v4466_v61  ;;  %v4475_v63 = vsub.s32 1, %v4466_v61 }
  0xca   :  { %1137 = vmatprep.subr.bf16.mxu0 %v3536_v62  ;;  %v1188_v62 = vld [vmem:[%s5206_s3] sm:$0x3] }
  0xcb   :  { %2370 = vmatpush1.bf16.msra.mxu1 %v3584_v59  ;;  %v1213_v4 = vrot.slane %v1208_v0, %v4469_v48 }
  0xcd   :  { %1138 = vmatpush1.bf16.msra.mxu0 %v3534_v1  ;;  %v1193_v1 = vrot.slane %v1188_v62, %v4469_v48 }
  0xce   :  { %1139 = vmatprep.subr.bf16.mxu0 %v3539_v2  ;;  %v1197_v2 = vrot.slane %v1188_v62, %v4475_v63 }
  0xd0   :  { %1125 = vmatmul.mubr.bf16.gmra.mrb[4].mxu0 %v319_v9  ;;  %v4484_v9 = vrot.slane %v1208_v0, %v4475_v63 }
  0xd1   :  { %1140 = vmatpush1.bf16.msra.mxu0 %v3537_v7  ;;  %1167 = vmatprep.mubr.bf16.mxu0 %v3724_v11  ;;  %v1266_v7 = vld [vmem:[#allocation2 + $0x20] sm:$0x1] }
  0xd2   :  { %1141 = vmatprep.subr.bf16.mxu0 %v3542_v8 }
  0xd5   :  { %1142 = vmatpush1.bf16.msra.mxu0 %v3540_v10 }
  0xd6   :  { %1143 = vmatprep.subr.bf16.mxu0 %v3545_v12 }
  0xd9   :  { %1144 = vmatpush1.bf16.msra.mxu0 %v3543_v13 }
  0xda   :  { %1145 = vmatprep.subr.bf16.mxu0 %v3548_v15 }
  0xdd   :  { %1146 = vmatpush1.bf16.msra.mxu0 %v3546_v16 }
  0xe0   :  { %3103 = vmatmul.mubr.msk.bf16.vlgmr.msra.gmra.mrb[0].mxu0 %vm5217_vm8, %v298_v20 }
  0xe1   :  { %1177 = vmatprep.mubr.bf16.mxu0 %v3724_v11 }
  0xe8   :  { %3104 = vmatmul.mubr.msk.bf16.gmra.mrb[4].mxu0 %vm5217_vm8, %v300_v22  ;;  %vm1259_vm8 = vsmask.f32 7954  ;;  %v3585_v22 = vld [vmem:[%s5205_s5 + $0xc4] ss:$8 sps:$4 sm:$0xff]  }
  0xe9   :  { %vm1260_vm7 = vmand %vm1239_vm13, %vm1259_vm8  ;;  %2371 = vmatprep.subr.bf16.mxu1 %v3585_v22 }
  0xea   :  { %vm1261_vm11 = vmor %vm1260_vm7, %vm1258_vm15  ;;  %vm1278_vm15 = vcmask 122880   ;;  %2372 = vmatpush1.bf16.msra.mxu1 %v3587_v28 }
  0xeb   :  { %v1263_v51 = vsel %vm1261_vm11, 0, %v1262_v40  ;;  %vm4419_vm13 = vmand %vm1246_vm0, %vm1257_vm2  ;;  %v1270_v6 = vsel %vm1261_vm11, 0, %v1269_v41  ;;  %2373 = vmatprep.subr.bf16.mxu1 %v3588_v33  ;;  %vm1402_vm11 = vcmask 1040512  }
  0xec   :  { %1264 = vst [vmem:[#allocation2 + $0x18] sm:$0x11] %v1263_v51  ;;  %1271 = vst [vmem:[#allocation2 + $0x3c] sm:$0x11] %v1270_v6  ;;  %v1267_v10 = vsel %vm4419_vm13, 0, %v1266_v7  ;;  %v1273_v39 = vsel %vm4419_vm13, 0, %v1272_v34 }
  0xed   :  { %vm4431_vm7 = vmand %vm1386_vm6, %vm1259_vm8  ;;  %1268 = vst [vmem:[#allocation2 + $0x20] sm:$0x1] %v1267_v10  ;;  %vm1286_vm8 = vcmask 254080   ;;  %vm1365_vm13 = vcmask 130048   ;;  %v1389_v34 = vld [vmem:[#allocation2] sm:$0xff] }
  0xee   :  { %vm1388_vm0 = vmor %vm4431_vm7, %vm4425_vm9  ;;  %1287 = vst.msk [vmem:[#allocation2 + $0x20] sm:$0x1] %vm1286_vm8, %v3724_v11  ;;  %2374 = vmatpush1.bf16.msra.mxu1 %v3590_v37  ;;  %vm5254_vm7 = vcmask 523264  }
  0xef   :  { %1279 = vst.msk [vmem:[#allocation2 + $0x18] sm:$0x1] %vm1278_vm15, %v3724_v11  ;;  %1282 = vst.msk [vmem:[#allocation2 + $0x3c] sm:$0x1] %vm1278_vm15, %v3724_v11  ;;  %2375 = vmatprep.subr.bf16.mxu1 %v3591_v5 }
  0xf0   :  { %1274 = vst [vmem:[#allocation2 + $0x44] sm:$0x1] %v1273_v39 }
  0xf1   :  { %1290 = vst.msk [vmem:[#allocation2 + $0x44] sm:$0x1] %vm1286_vm8, %v3724_v11  ;;  %vm5239_vm8 = vcmask 125952  }
  0xf2   :  { %2376 = vmatpush1.bf16.msra.mxu1 %v3593_v14  ;;  %vm4544_vm10 = vmand %vm5239_vm8, %vm1257_vm2 }
  0xf3   :  { %vm4558_vm2 = vmor %vm1386_vm6, %vm1384_vm3 }
  0xf4   :  { %vm5248_vm6 = vmmov %vm5239_vm8 }
  0xf5   :  { %vm5249_vm9 = vmmov %vm5248_vm6 }
  0xf6   :  { %vm5257_vm8 = vmmov %vm5254_vm7 }
 0x1b3   :  { %v1169_v8 = vpop.f32.mrb[0].mxu0 }
 0x1b4   :  { %v1200_v12 = vmul.f32 %v1193_v1, %v1169_v8  ;;  %v1171_v13 = vpop.f32.mrb[1].mxu0 }
 0x1b5   :  { %v1201_v15 = vmul.f32 %v1197_v2, %v1171_v13  ;;  %v1173_v16 = vpop.f32.mrb[2].mxu0 }
 0x1b6   :  { %v1220_v17 = vadd.f32 %v1213_v4, %v1200_v12  ;;  %v1202_v20 = vmul.f32 %v1193_v1, %v1173_v16  ;;  %v1175_v21 = vpop.f32.mrb[3].mxu0 }
 0x1b7   :  { %v1221_v26 = vadd.f32 %v4484_v9, %v1201_v15  ;;  %v1203_v27 = vmul.f32 %v1197_v2, %v1175_v21 }
 0x1b8   :  { %v1228_v43 = vmax.f32 %v1220_v17, 0.0  ;;  %v1222_v44 = vadd.f32 %v1213_v4, %v1202_v20 }
 0x1b9   :  { %v1229_v24 = vmax.f32 %v1221_v26, 0.0  ;;  %v1223_v31 = vadd.f32 %v4484_v9, %v1203_v27 }
 0x1ba   :  { %v1230_v32 = vmax.f32 %v1222_v44, 0.0 }
 0x1bb   :  { %v3247_v35 = vpack.c.bf16 %v1229_v24, %v1228_v43  ;;  %v1231_v38 = vmax.f32 %v1223_v31, 0.0  ;;  %v1179_v42 = vpop.f32.mrb[4].mxu0  ;;  %v3599_v24 = vld [vmem:[%s5205_s5 + $0x104] ss:$8 sps:$4 sm:$0xff]  }
 0x1bc   :  { %v1204_v40 = vmul.f32 %v1193_v1, %v1179_v42  ;;  %v1181_v41 = vpop.f32.mrb[5].mxu0  ;;  %v3600_v42 = vld [vmem:[%s5205_s5 + $0x110] ss:$8 sps:$4 sm:$0xff]  }
 0x1bd   :  { %v3248_v45 = vpack.c.bf16 %v1231_v38, %v1230_v32  ;;  %v1205_v46 = vmul.f32 %v1197_v2, %v1181_v41  ;;  %v1183_v47 = vpop.f32.mrb[6].mxu0  ;;  %v1314_v49 = vshrl.u32 %v3247_v35, 16  ;;  %v1317_v57 = vshll.u32 %v3247_v35, 16  ;;  %v1394_v32 = vld [vmem:[#allocation2 + $0x8] sm:$0xf] }
 0x1be   :  { %v1224_v19 = vadd.f32 %v1213_v4, %v1204_v40  ;;  %v1206_v50 = vmul.f32 %v1193_v1, %v1183_v47  ;;  %v1185_v51 = vpop.f32.mrb[7].mxu0  ;;  %v1410_v47 = vld [vmem:[#allocation2 + $0x20] sm:$0x1] }
 0x1bf   :  { %v1322_v6 = vshrl.u32 %v3248_v45, 16  ;;  %v1225_v54 = vadd.f32 %v4484_v9, %v1205_v46  ;;  %v1207_v55 = vmul.f32 %v1197_v2, %v1185_v51  ;;  %v1316_v56 = vrot.slane %v1314_v49, 7 }
 0x1c0   :  { %v1232_v18 = vmax.f32 %v1224_v19, 0.0  ;;  %v1226_v23 = vadd.f32 %v1213_v4, %v1206_v50  ;;  %v1325_v59 = vshll.u32 %v3248_v45, 16  ;;  %v3594_v4 = vld [vmem:[%s5205_s5 + $0xf4] ss:$8 sps:$4 sm:$0xff]  }
 0x1c1   :  { %v1324_v58 = vrot.slane %v1322_v6, 7  ;;  %v1233_v60 = vmax.f32 %v1225_v54, 0.0  ;;  %v1227_v62 = vadd.f32 %v4484_v9, %v1207_v55  ;;  %v1319_v1 = vor.u32 %v1317_v57, %v1316_v56  ;;  %v3596_v9 = vld [vmem:[%s5205_s5 + $0xf0] ss:$8 sps:$4 sm:$0xff]   ;;  %2377 = vmatprep.subr.bf16.mxu1 %v3594_v4  ;;  %v1416_v54 = vld [vmem:[#allocation2 + $0x2c] sm:$0xf] }
 0x1c2   :  { %v1234_v0 = vmax.f32 %v1226_v23, 0.0  ;;  %v1320_v10 = vrot.slane %v1316_v56, 4  ;;  %2378 = vmatpush1.bf16.msra.mxu1 %v3596_v9  ;;  %v1405_v50 = vld [vmem:[#allocation2 + $0x18] sm:$0x11]  ;;  %v1413_v56 = vld [vmem:[#allocation2 + $0x24] sm:$0xff] }
 0x1c3   :  { %v3249_v7 = vpack.c.bf16 %v1233_v60, %v1232_v18  ;;  %v1235_v8 = vmax.f32 %v1227_v62, 0.0  ;;  %v1327_v12 = vor.u32 %v1325_v59, %v1324_v58  ;;  %1347 = vrot.lane.b32.xlu0 %v1319_v1, %s3725_s15  ;;  %v1329_v17 = vrot.slane %v1324_v58, 4  ;;  %2400 = vmatprep.subr.bf16.mxu1 %v3599_v24  ;;  %v1424_v62 = vld [vmem:[#allocation2 + $0x44] sm:$0x1] }
 0x1c5   :  { %v3250_v13 = vpack.c.bf16 %v1235_v8, %v1234_v0  ;;  %v1328_v15 = vsel %vm4525_vm14, %v1320_v10, %v1327_v12  ;;  %v1331_v16 = vshrl.u32 %v3249_v7, 16  ;;  %v1334_v22 = vshll.u32 %v3249_v7, 16  ;;  %v1421_v10 = vld [vmem:[#allocation2 + $0x3c] sm:$0x11] }
 0x1c6   :  { %1349 = vrot.lane.b32.xlu1 %v1328_v15, %s3725_s15 }
 0x1c7   :  { %v1339_v20 = vshrl.u32 %v3250_v13, 16  ;;  %v1333_v21 = vrot.slane %v1331_v16, 7  ;;  %1351 = vrot.lane.b32.xlu0 %v1329_v17, %s3725_s15  ;;  %v1342_v26 = vshll.u32 %v3250_v13, 16 }
 0x1c9   :  { %v1341_v25 = vrot.slane %v1339_v20, 7  ;;  %v1336_v27 = vor.u32 %v1334_v22, %v1333_v21  ;;  %v1337_v28 = vrot.slane %v1333_v21, 4 }
 0x1cb   :  { %1353 = vrot.lane.b32.xlu1 %v1336_v27, %s3725_s15  ;;  %v1344_v29 = vor.u32 %v1342_v26, %v1341_v25  ;;  %v1346_v44 = vrot.slane %v1341_v25, 4  ;;  %v3597_v25 = vld [vmem:[%s5205_s5 + $0x100] ss:$8 sps:$4 sm:$0xff]  }
 0x1cd   :  { %v1345_v43 = vsel %vm4525_vm14, %v1337_v28, %v1344_v29  ;;  %vm4549_vm14 = vmand %vm1402_vm11, %vm1237_vm12 }
 0x1ce   :  { %1355 = vrot.lane.b32.xlu0 %v1345_v43, %s3725_s15  ;;  %vm4571_vm11 = vmand %vm1278_vm15, %vm1237_vm12 }
 0x1cf   :  { %1357 = vrot.lane.b32.xlu1 %v1346_v44, %s3725_s15  ;;  %vm1404_vm3 = vmor %vm4382_vm1, %vm4549_vm14  ;;  %v3602_v44 = vld [vmem:[%s5205_s5 + $0x114] ss:$8 sps:$4 sm:$0xff]  }
 0x1d0   :  { %vm5256_vm15 = vmmov %vm5254_vm7 }
 0x1d1   :  { %vm5259_vm14 = vmmov %vm5254_vm7 }
 0x235   :  { %v1348_v33 = vpop.permute.xlu0 %1347 }
 0x236   :  { %v1359_v35 = vrot.slane %v1348_v33, 4 }
 0x238   :  { %v1350_v38 = vpop.permute.xlu1 %1349  ;;  %v1366_v37 = vsel %vm1365_vm13, %v1359_v35, %v1348_v33  ;;  %v1395_v39 = vsel %vm4544_vm10, %v1359_v35, %v1394_v32 }
 0x239   :  { %v1360_v41 = vrot.slane %v1350_v38, 4  ;;  %v4567_v45 = vsel %vm1388_vm0, %v1366_v37, %v1389_v34  ;;  %1396 = vst [vmem:[#allocation2 + $0x8] sm:$0xf] %v1395_v39  ;;  %v1352_v49 = vpop.permute.xlu0 %1351 }
 0x23a   :  { %1391 = vst [vmem:[#allocation2] sm:$0xff] %v4567_v45  ;;  %v1361_v51 = vrot.slane %v1352_v49, 4  ;;  %v1440_v14 = vshrl.u32 %v4567_v45, 16  ;;  %v1443_v18 = vshll.u32 %v4567_v45, 16 }
 0x23b   :  { %v1367_v19 = vsel %vm1365_vm13, %v1360_v41, %v1350_v38  ;;  %1401 = vst.msk [vmem:[#allocation2 + $0x14] sm:$0xf] %vm5248_vm6, %v1360_v41  ;;  %v3605_v41 = vld [vmem:[%s5205_s5 + $0x124] ss:$8 sps:$4 sm:$0xff]  }
 0x23c   :  { %1400 = vst.msk [vmem:[#allocation2 + $0xc] sm:$0xff] %vm4558_vm2, %v1367_v19  ;;  %v1368_v5 = vsel %vm1365_vm13, %v1361_v51, %v1352_v49  ;;  %v1411_v6 = vsel %vm4571_vm11, %v1361_v51, %v1410_v47  ;;  %v1442_v4 = vrot.slane %v1440_v14, 4  ;;  %v1445_v7 = vrot.slane %v1443_v18, 5 }
 0x23d   :  { %v1354_v55 = vpop.permute.xlu1 %1353  ;;  %v1406_v23 = vsel %vm1404_vm3, %v1368_v5, %v1405_v50  ;;  %1412 = vst [vmem:[#allocation2 + $0x20] sm:$0x1] %v1411_v6 }
 0x23e   :  { %v1362_v57 = vrot.slane %v1354_v55, 4  ;;  %1407 = vst [vmem:[#allocation2 + $0x18] sm:$0x11] %v1406_v23  ;;  %v1446_v27 = vor.u32 %v1445_v7, %v1442_v4 }
 0x240   :  { %v1369_v58 = vsel %vm1365_vm13, %v1362_v57, %v1354_v55  ;;  %v1417_v59 = vsel %vm4544_vm10, %v1362_v57, %v1416_v54  ;;  %v1356_v60 = vpop.permute.xlu0 %1355  ;;  %v4604_v8 = vld [vmem:[#allocation2 + $0x8] sm:$0xf]  ;;  %v1447_v37 = vrot.slane %v1446_v27, 4 }
 0x241   :  { %v4602_v0 = vsel %vm1388_vm0, %v1369_v58, %v1413_v56  ;;  %1418 = vst [vmem:[#allocation2 + $0x2c] sm:$0xf] %v1417_v59  ;;  %v1363_v1 = vrot.slane %v1356_v60, 4  ;;  %v1358_v2 = vpop.permute.xlu1 %1357  ;;  %v1454_v52 = vshrl.u32 %v4604_v8, 16  ;;  %v1457_v16 = vshll.u32 %v4604_v8, 16 }
 0x242   :  { %1415 = vst [vmem:[#allocation2 + $0x24] sm:$0xff] %v4602_v0  ;;  %v1364_v12 = vrot.slane %v1358_v2, 4  ;;  %v1488_v9 = vshrl.u32 %v4602_v0, 16  ;;  %v1491_v53 = vshll.u32 %v4602_v0, 16  ;;  %v4634_v43 = vld [vmem:[#allocation2 + $0x14] sm:$0xf] }
 0x243   :  { %v1370_v13 = vsel %vm1365_vm13, %v1363_v1, %v1356_v60  ;;  %1420 = vst.msk [vmem:[#allocation2 + $0x38] sm:$0xf] %vm5249_vm9, %v1363_v1  ;;  %v4612_v15 = vld [vmem:[#allocation2 + $0xc] sm:$0xff]  ;;  %v4641_v32 = vrot.slane %v1454_v52, 4  ;;  %v4644_v38 = vrot.slane %v1457_v16, 5  ;;  %v1463_v40 = vshll.u32 %v4634_v43, 16 }
 0x244   :  { %1419 = vst.msk [vmem:[#allocation2 + $0x30] sm:$0xff] %vm4558_vm2, %v1370_v13  ;;  %v1371_v17 = vsel %vm1365_vm13, %v1364_v12, %v1358_v2  ;;  %v1425_v20 = vsel %vm4571_vm11, %v1364_v12, %v1424_v62  ;;  %v3114_v21 = vcombine.high %v4567_v45, %v4612_v15  ;;  %v3113_v22 = vcombine.low %v4567_v45, %v4612_v15  ;;  %v4655_v49 = vld [vmem:[#allocation2 + $0x20] sm:$0x1]  ;;  %v3608_v12 = vld [vmem:[%s5205_s5 + $0x134] ss:$8 sps:$4 sm:$0xff]   ;;  %vm5260_vm2 = vmmov %vm5254_vm7 }
 0x245   :  { %v1422_v26 = vsel %vm1404_vm3, %v1371_v17, %v1421_v10  ;;  %1426 = vst [vmem:[#allocation2 + $0x44] sm:$0x1] %v1425_v20  ;;  %v1449_v28 = vshll.u32 %v4612_v15, 16  ;;  %v1467_v29 = vshrl.u32 %v4612_v15, 16  ;;  %v4639_v24 = vld [vmem:[#allocation2 + $0x18] sm:$0x11]  ;;  %v1460_v6 = vor.u32 %v4644_v38, %v4641_v32  ;;  %vm5262_vm6 = vmmov %vm5260_vm2 }
 0x246   :  { %1423 = vst [vmem:[#allocation2 + $0x3c] sm:$0x11] %v1422_v26  ;;  %2379 = vmatprep.mubr.bf16.mxu1 %v3114_v21  ;;  %v1490_v36 = vrot.slane %v1488_v9, 4  ;;  %v1493_v31 = vrot.slane %v1491_v53, 5  ;;  %v1473_v35 = vshll.u32 %v4639_v24, 16  ;;  %v1553_v46 = vrot.slane %v4612_v15, 5 }
 0x247   :  { %2380 = vmatmul.mubr.bf16.vlgmr.msra.gmra.mrb[0].mxu1 %v3113_v22  ;;  %v1451_v33 = vrot.slane %v1449_v28, 5  ;;  %v1469_v34 = vrot.slane %v1467_v29, 4  ;;  %v1560_v47 = vrot.slane %v4639_v24, 5  ;;  %v1477_v19 = vshrl.u32 %v4634_v43, 16  ;;  %v3603_v57 = vld [vmem:[%s5205_s5 + $0x120] ss:$8 sps:$4 sm:$0xff]  }
 0x248   :  { %2401 = vmatpush1.bf16.msra.mxu1 %v3597_v25  ;;  %v1494_v45 = vor.u32 %v1493_v31, %v1490_v36  ;;  %v1475_v5 = vrot.slane %v1473_v35, 5  ;;  %v4662_v54 = vrot.slane %v1463_v40, 5  ;;  %v4670_v56 = vld [vmem:[#allocation2 + $0x2c] sm:$0xf]  ;;  %v3606_v16 = vld [vmem:[%s5205_s5 + $0x130] ss:$8 sps:$4 sm:$0xff]  }
 0x249   :  { %v1470_v39 = vor.u32 %v1469_v34, %v1451_v33  ;;  %2402 = vmatprep.subr.bf16.mxu1 %v3602_v44  ;;  %v1452_v58 = vsel %vm3863_vm4, %v1447_v37, %v1451_v33  ;;  %v1479_v62 = vrot.slane %v1477_v19, 4  ;;  %v1502_v52 = vshrl.u32 %v4670_v56, 16  ;;  %v3611_v25 = vld [vmem:[%s5205_s5 + $0x144] ss:$8 sps:$4 sm:$0xff]  }
 0x24a   :  { %v4682_v1 = vld [vmem:[#allocation2 + $0x38] sm:$0xf]  ;;  %v1505_v13 = vshll.u32 %v4670_v56, 16  ;;  %v1559_v20 = vrot.slane %v1553_v46, 4  ;;  %v1495_v26 = vrot.slane %v1494_v45, 4  ;;  %v1461_v38 = vrot.slane %v1460_v6, 4 }
 0x24b   :  { %v4658_v50 = vld [vmem:[#allocation2 + $0x30] sm:$0xff]  ;;  %v1471_v51 = vrot.slane %v1470_v39, 4  ;;  %v1480_v53 = vor.u32 %v1479_v62, %v4662_v54  ;;  %v1511_v21 = vshll.u32 %v4682_v1, 16  ;;  %v1525_v22 = vshrl.u32 %v4682_v1, 16  ;;  %v1535_v31 = vld [vmem:[#allocation2] sm:$0xee] }
 0x24c   :  { %v3117_v55 = vcombine.high %v4602_v0, %v4658_v50  ;;  %v3116_v14 = vcombine.low %v4602_v0, %v4658_v50  ;;  %v1497_v18 = vshll.u32 %v4658_v50, 16  ;;  %v1515_v23 = vshrl.u32 %v4658_v50, 16  ;;  %2403 = vmatpush1.bf16.msra.mxu1 %v3600_v42  ;;  %v4703_v28 = vld [vmem:[#allocation2 + $0x44] sm:$0x1] }
 0x24d   :  { %v1476_v59 = vsel %vm3863_vm4, %v1471_v51, %v1475_v5  ;;  %v4679_v60 = vld [vmem:[#allocation2 + $0x3c] sm:$0x11]  ;;  %v1483_v0 = vshll.u32 %v4655_v49, 16  ;;  %2404 = vmatprep.subr.bf16.mxu1 %v3605_v41  ;;  %v1504_v29 = vrot.slane %v1502_v52, 4  ;;  %v1507_v44 = vrot.slane %v1505_v13, 5 }
 0x24e   :  { %2389 = vmatprep.mubr.bf16.mxu1 %v3117_v55  ;;  %v3120_v2 = vcombine.high %v1452_v58, %v1476_v59  ;;  %v3119_v4 = vcombine.low %v1452_v58, %v1476_v59  ;;  %v1499_v7 = vrot.slane %v1497_v18, 5  ;;  %v1517_v10 = vrot.slane %v1515_v23, 4  ;;  %v3609_v5 = vld [vmem:[%s5205_s5 + $0x140] ss:$8 sps:$4 sm:$0xff]   ;;  %v3614_v23 = vld [vmem:[%s5205_s5 + $0x154] ss:$8 sps:$4 sm:$0xff]  }
 0x24f   :  { %2390 = vmatmul.mubr.bf16.gmra.mrb[4].mxu1 %v3116_v14  ;;  %v1521_v9 = vshll.u32 %v4679_v60, 16  ;;  %v1481_v32 = vrot.slane %v1480_v53, 4  ;;  %v1513_v33 = vrot.slane %v1511_v21, 5  ;;  %v1527_v34 = vrot.slane %v1525_v22, 4  ;;  %v3617_v15 = vld [vmem:[%s5205_s5 + $0x164] ss:$8 sps:$4 sm:$0xff]  }
 0x250   :  { %1625 = vrot.lane.b32.xlu1 %v3120_v2, %s3722_s14  ;;  %1623 = vrot.lane.b32.xlu0 %v3119_v4, %s3722_s14  ;;  %v1518_v17 = vor.u32 %v1517_v10, %v1499_v7  ;;  %v1500_v35 = vsel %vm3863_vm4, %v1495_v26, %v1499_v7  ;;  %v1485_v42 = vrot.slane %v1483_v0, 5  ;;  %v1508_v39 = vor.u32 %v1507_v44, %v1504_v29  ;;  %v3612_v0 = vld [vmem:[%s5205_s5 + $0x150] ss:$8 sps:$4 sm:$0xff]   ;;  %v1537_v2 = vld [vmem:[#allocation2 + $0x24] sm:$0xee] }
 0x251   :  { %v1523_v27 = vrot.slane %v1521_v9, 5  ;;  %2405 = vmatpush1.bf16.msra.mxu1 %v3603_v57  ;;  %v1528_v40 = vor.u32 %v1527_v34, %v1513_v33  ;;  %v1531_v41 = vshll.u32 %v4703_v28, 16  ;;  %v3109_v51 = vrot.slane %v1535_v31, 9  ;;  %v1536_v26 = vld [vmem:[#allocation2 + $0x8] sm:$0xe] }
 0x252   :  { %v1519_v36 = vrot.slane %v1518_v17, 4  ;;  %2406 = vmatprep.subr.bf16.mxu1 %v3608_v12  ;;  %v1561_v6 = vsel %vm3913_vm5, %v1559_v20, %v1560_v47  ;;  %v1486_v55 = vsel %vm3863_vm4, %v1481_v32, %v1485_v42  ;;  %v1567_v18 = vrot.slane %v4658_v50, 5 }
 0x253   :  { %v1529_v14 = vrot.slane %v1528_v40, 4  ;;  %v1554_v24 = vsel %vm3913_vm5, %v3109_v51, %v1553_v46  ;;  %v1466_v47 = vsel %vm3863_vm4, %v1461_v38, %v4662_v54  ;;  %v1509_v57 = vrot.slane %v1508_v39, 4  ;;  %v3626_v39 = vld [vmem:[%s5205_s5 + $0x194] ss:$8 sps:$4 sm:$0xff]   ;;  %v3629_v40 = vld [vmem:[%s5205_s5 + $0x1a4] ss:$8 sps:$4 sm:$0xff]  }
 0x254   :  { %v1524_v37 = vsel %vm3863_vm4, %v1519_v36, %v1523_v27  ;;  %v1533_v50 = vrot.slane %v1531_v41, 5  ;;  %v3125_v58 = vcombine.low %v1554_v24, %v1561_v6  ;;  %v3121_v59 = vcombine.low %v1466_v47, %v1486_v55  ;;  %v3627_v41 = vld [vmem:[%s5205_s5 + $0x1a0] ss:$8 sps:$4 sm:$0xff]   ;;  %v3635_v51 = vld [vmem:[%s5205_s5 + $0x1c4] ss:$8 sps:$4 sm:$0xff]  }
 0x255   :  { %v3123_v45 = vcombine.high %v1500_v35, %v1524_v37  ;;  %v3122_v19 = vcombine.low %v1500_v35, %v1524_v37  ;;  %2407 = vmatpush1.bf16.msra.mxu1 %v3606_v16  ;;  %v1574_v62 = vrot.slane %v4679_v60, 5  ;;  %v3115_v46 = vcombine.low %v4604_v8, %v4634_v43  ;;  %v3615_v16 = vld [vmem:[%s5205_s5 + $0x160] ss:$8 sps:$4 sm:$0xff]   ;;  %v3636_v55 = vld [vmem:[%s5205_s5 + $0x1d0] ss:$8 sps:$4 sm:$0xff]  }
 0x256   :  { %2408 = vmatprep.subr.bf16.mxu1 %v3611_v25  ;;  %v1534_v54 = vsel %vm3863_vm4, %v1529_v14, %v1533_v50  ;;  %v1573_v4 = vrot.slane %v1567_v18, 4  ;;  %v1571_v7 = vrot.slane %v4682_v1, 5  ;;  %v1557_v60 = vrot.slane %v4634_v43, 5  ;;  %v1538_v25 = vld [vmem:[#allocation2 + $0x2c] sm:$0xe] }
 0x257   :  { %1631 = vrot.lane.b32.xlu1 %v3123_v45, %s3722_s14  ;;  %1629 = vrot.lane.b32.xlu0 %v3122_v19, %s3722_s14  ;;  %v3118_v10 = vcombine.low %v4670_v56, %v4682_v1  ;;  %v1514_v12 = vsel %vm3863_vm4, %v1509_v57, %v1513_v33  ;;  %v3126_v53 = vcombine.high %v1554_v24, %v1561_v6  ;;  %v3111_v52 = vrot.slane %v1537_v2, 9  ;;  %v3623_v33 = vld [vmem:[%s5205_s5 + $0x184] ss:$8 sps:$4 sm:$0xff]   ;;  %v3621_v37 = vld [vmem:[%s5205_s5 + $0x180] ss:$8 sps:$4 sm:$0xff]  }
 0x258   :  { %v3124_v9 = vcombine.low %v1514_v12, %v1534_v54  ;;  %v1577_v13 = vrot.slane %v4703_v28, 5  ;;  %v1575_v17 = vsel %vm3913_vm5, %v1573_v4, %v1574_v62  ;;  %v1576_v20 = vrot.slane %v1571_v7, 4  ;;  %v3632_v45 = vld [vmem:[%s5205_s5 + $0x1b4] ss:$8 sps:$4 sm:$0xff]   ;;  %v3630_v19 = vld [vmem:[%s5205_s5 + $0x1b0] ss:$8 sps:$4 sm:$0xff]  }
 0x259   :  { %2409 = vmatpush1.bf16.msra.mxu1 %v3609_v5  ;;  %v1562_v21 = vrot.slane %v1557_v60, 4  ;;  %v1563_v22 = vrot.slane %v4655_v49, 5  ;;  %v1568_v27 = vsel %vm3913_vm5, %v3111_v52, %v1567_v18  ;;  %v3618_v49 = vld [vmem:[%s5205_s5 + $0x170] ss:$8 sps:$4 sm:$0xff]   ;;  %v3112_v44 = vrot.slane %v1538_v25, 9 }
 0x25a   :  { %2410 = vmatprep.subr.bf16.mxu1 %v3614_v23  ;;  %v3129_v28 = vcombine.high %v1568_v27, %v1575_v17  ;;  %v3128_v29 = vcombine.low %v1568_v27, %v1575_v17  ;;  %v1578_v36 = vsel %vm3913_vm5, %v1576_v20, %v1577_v13  ;;  %v3110_v31 = vrot.slane %v1536_v26, 9  ;;  %v3633_v5 = vld [vmem:[%s5205_s5 + $0x1c0] ss:$8 sps:$4 sm:$0xff]   ;;  %v3638_v6 = vld [vmem:[%s5205_s5 + $0x1d4] ss:$8 sps:$4 sm:$0xff]  }
 0x25b   :  { %1659 = vrot.lane.b32.xlu1 %v3125_v58, %s3723_s25  ;;  %1627 = vrot.lane.b32.xlu0 %v3121_v59, %s3722_s14  ;;  %v1564_v32 = vsel %vm3913_vm5, %v1562_v21, %v1563_v22  ;;  %v1572_v34 = vsel %vm3913_vm5, %v3112_v44, %v1571_v7  ;;  %v3641_v14 = vld [vmem:[%s5205_s5 + $0x1e4] ss:$8 sps:$4 sm:$0xff]   ;;  %v3639_v18 = vld [vmem:[%s5205_s5 + $0x1e0] ss:$8 sps:$4 sm:$0xff]   ;;  %vm5250_vm4 = vcmask 261120   ;;  %vm5261_vm11 = vcmask 785408  }
 0x25c   :  { %v1558_v35 = vsel %vm3913_vm5, %v3110_v31, %v1557_v60  ;;  %v3130_v38 = vcombine.low %v1572_v34, %v1578_v36  ;;  %v3644_v23 = vld [vmem:[%s5205_s5 + $0x1f4] ss:$8 sps:$4 sm:$0xff]   ;;  %v3642_v24 = vld [vmem:[%s5205_s5 + $0x1f0] ss:$8 sps:$4 sm:$0xff]   ;;  %v3648_v47 = vld [vmem:[%s5205_s5 + $0x204] ss:$8 sps:$4 sm:$0xff]  }
 0x25d   :  { %2411 = vmatpush1.bf16.msra.mxu1 %v3612_v0  ;;  %v3127_v42 = vcombine.low %v1558_v35, %v1564_v32  ;;  %v3646_v58 = vld [vmem:[%s5205_s5 + $0x200] ss:$8 sps:$4 sm:$0xff]   ;;  %vm5251_vm5 = vmmov %vm5250_vm4  ;;  %v3651_v0 = vld [vmem:[%s5205_s5 + $0x214] ss:$8 sps:$4 sm:$0xff]   ;;  %vm2663_vm9 = vcmask 1041409  }
 0x25e   :  { %2412 = vmatprep.subr.bf16.mxu1 %v3617_v15  ;;  %v3649_v15 = vld [vmem:[%s5205_s5 + $0x210] ss:$8 sps:$4 sm:$0xff]   ;;  %v3654_v8 = vld [vmem:[%s5205_s5 + $0x224] ss:$8 sps:$4 sm:$0xff]   ;;  %vm5252_vm12 = vmmov %vm5250_vm4 }
 0x25f   :  { %1633 = vrot.lane.b32.xlu1 %v3124_v9, %s3722_s14  ;;  %1661 = vrot.lane.b32.xlu0 %v3126_v53, %s3723_s25  ;;  %v3652_v2 = vld [vmem:[%s5205_s5 + $0x220] ss:$8 sps:$4 sm:$0xff]   ;;  %vm5253_vm1 = vmmov %vm5250_vm4  ;;  %v3658_v7 = vld [vmem:[%s5205_s5 + $0x234] ss:$8 sps:$4 sm:$0xff]  }
 0x260   :  { %v3656_v12 = vld [vmem:[%s5205_s5 + $0x230] ss:$8 sps:$4 sm:$0xff]   ;;  %v3661_v56 = vld [vmem:[%s5205_s5 + $0x244] ss:$8 sps:$4 sm:$0xff]   ;;  %v3659_v9 = vld [vmem:[%s5205_s5 + $0x240] ss:$8 sps:$4 sm:$0xff]  }
 0x261   :  { %2413 = vmatpush1.bf16.msra.mxu1 %v3615_v16  ;;  %v3664_v52 = vld [vmem:[%s5205_s5 + $0x254] ss:$8 sps:$4 sm:$0xff]   ;;  %v3662_v13 = vld [vmem:[%s5205_s5 + $0x250] ss:$8 sps:$4 sm:$0xff]   ;;  %v3667_v16 = vld [vmem:[%s5205_s5 + $0x264] ss:$8 sps:$4 sm:$0xff]  }
 0x262   :  { %2414 = vmatprep.subr.bf16.mxu1 %v3620_v30  ;;  %v3665_v17 = vld [vmem:[%s5205_s5 + $0x260] ss:$8 sps:$4 sm:$0xff]   ;;  %v3670_v20 = vld [vmem:[%s5205_s5 + $0x274] ss:$8 sps:$4 sm:$0xff]   ;;  %v3668_v21 = vld [vmem:[%s5205_s5 + $0x270] ss:$8 sps:$4 sm:$0xff]  }
 0x263   :  { %1667 = vrot.lane.b32.xlu1 %v3129_v28, %s3723_s25  ;;  %1665 = vrot.lane.b32.xlu0 %v3128_v29, %s3723_s25  ;;  %v3673_v22 = vld [vmem:[%s5205_s5 + $0x284] ss:$8 sps:$4 sm:$0xff]   ;;  %v3671_v30 = vld [vmem:[%s5205_s5 + $0x280] ss:$8 sps:$4 sm:$0xff]   ;;  %vm5255_vm0 = vmmov %vm5253_vm1 }
 0x264   :  { %v3676_v25 = vld [vmem:[%s5205_s5 + $0x294] ss:$8 sps:$4 sm:$0xff]   ;;  %v3674_v26 = vld [vmem:[%s5205_s5 + $0x290] ss:$8 sps:$4 sm:$0xff]   ;;  %v3679_v27 = vld [vmem:[%s5205_s5 + $0x2a4] ss:$8 sps:$4 sm:$0xff]  }
 0x265   :  { %2415 = vmatpush1.bf16.msra.mxu1 %v3618_v49  ;;  %v3677_v28 = vld [vmem:[%s5205_s5 + $0x2a0] ss:$8 sps:$4 sm:$0xff]   ;;  %v3682_v29 = vld [vmem:[%s5205_s5 + $0x2b4] ss:$8 sps:$4 sm:$0xff]   ;;  %v3680_v49 = vld [vmem:[%s5205_s5 + $0x2b0] ss:$8 sps:$4 sm:$0xff]  }
 0x266   :  { %2416 = vmatprep.subr.bf16.mxu1 %v3623_v33  ;;  %v3685_v44 = vld [vmem:[%s5205_s5 + $0x2c4] ss:$8 sps:$4 sm:$0xff]   ;;  %v3683_v36 = vld [vmem:[%s5205_s5 + $0x2c0] ss:$8 sps:$4 sm:$0xff]   ;;  %v3688_v31 = vld [vmem:[%s5205_s5 + $0x2d4] ss:$8 sps:$4 sm:$0xff]  }
 0x267   :  { %1669 = vrot.lane.b32.xlu1 %v3130_v38, %s3723_s25  ;;  %1663 = vrot.lane.b32.xlu0 %v3127_v42, %s3723_s25  ;;  %v3686_v32 = vld [vmem:[%s5205_s5 + $0x2d0] ss:$8 sps:$4 sm:$0xff]   ;;  %v3691_v33 = vld [vmem:[%s5205_s5 + $0x2e4] ss:$8 sps:$4 sm:$0xff]   ;;  %vm5258_vm10 = vmmov %vm5255_vm0 }
 0x268   :  { %v3689_v34 = vld [vmem:[%s5205_s5 + $0x2e0] ss:$8 sps:$4 sm:$0xff]   ;;  %v3694_v35 = vld [vmem:[%s5205_s5 + $0x2f4] ss:$8 sps:$4 sm:$0xff]   ;;  %v3692_v42 = vld [vmem:[%s5205_s5 + $0x2f0] ss:$8 sps:$4 sm:$0xff]  }
 0x269   :  { %2417 = vmatpush1.bf16.msra.mxu1 %v3621_v37  ;;  %v3697_v37 = vld [vmem:[%s5205_s5 + $0x304] ss:$8 sps:$4 sm:$0xff]   ;;  %vm5263_vm3 = vmmov %vm5261_vm11 }
 0x26a   :  { %2418 = vmatprep.subr.bf16.mxu1 %v3626_v39 }
 0x26d   :  { %2419 = vmatpush1.bf16.msra.mxu1 %v3624_v3 }
 0x26e   :  { %2420 = vmatprep.subr.bf16.mxu1 %v3629_v40 }
 0x271   :  { %2421 = vmatpush1.bf16.msra.mxu1 %v3627_v41  ;;  %v3695_v41 = vld [vmem:[%s5205_s5 + $0x300] ss:$8 sps:$4 sm:$0xff]  }
 0x272   :  { %2422 = vmatprep.subr.bf16.mxu1 %v3632_v45  ;;  %v3700_v45 = vld [vmem:[%s5205_s5 + $0x314] ss:$8 sps:$4 sm:$0xff]  }
 0x275   :  { %2423 = vmatpush1.bf16.msra.mxu1 %v3630_v19 }
 0x276   :  { %2424 = vmatprep.subr.bf16.mxu1 %v3635_v51 }
 0x279   :  { %2425 = vmatpush1.bf16.msra.mxu1 %v3633_v5  ;;  %v3698_v5 = vld [vmem:[%s5205_s5 + $0x310] ss:$8 sps:$4 sm:$0xff]  }
 0x27a   :  { %2426 = vmatprep.subr.bf16.mxu1 %v3638_v6  ;;  %v3703_v6 = vld [vmem:[%s5205_s5 + $0x324] ss:$8 sps:$4 sm:$0xff]  }
 0x27d   :  { %2427 = vmatpush1.bf16.msra.mxu1 %v3636_v55  ;;  %v3701_v55 = vld [vmem:[%s5205_s5 + $0x320] ss:$8 sps:$4 sm:$0xff]  }
 0x27e   :  { %2428 = vmatprep.subr.bf16.mxu1 %v3641_v14 }
 0x281   :  { %2429 = vmatpush1.bf16.msra.mxu1 %v3639_v18  ;;  %v3706_v18 = vld [vmem:[%s5205_s5 + $0x334] ss:$8 sps:$4 sm:$0xff]  }
 0x282   :  { %2430 = vmatprep.subr.bf16.mxu1 %v3644_v23 }
 0x285   :  { %2431 = vmatpush1.bf16.msra.mxu1 %v3642_v24  ;;  %v3704_v24 = vld [vmem:[%s5205_s5 + $0x330] ss:$8 sps:$4 sm:$0xff]  }
 0x286   :  { %2453 = vmatprep.subr.bf16.mxu1 %v3648_v47  ;;  %v3709_v47 = vld [vmem:[%s5205_s5 + $0x344] ss:$8 sps:$4 sm:$0xff]  }
 0x2c2   :  { %v4831_v57 = vpop.permute.xlu1 %1625  ;;  %v1624_v50 = vpop.permute.xlu0 %1623 }
 0x2c3   :  { %v1679_v59 = vsel %vm5250_vm4, %v3115_v46, %v1624_v50  ;;  %v1635_v62 = vsel %vm5251_vm5, %v1624_v50, %v4831_v57  ;;  %v3712_v50 = vld [vmem:[%s5205_s5 + $0x354] ss:$8 sps:$4 sm:$0xff]   ;;  %vm3727_vm4 = vmmov 0   ;;  %vm2826_vm5 = vcmask 1041408  }
 0x2c4   :  { %2432 = vmatprep.mubr.bf16.mxu1 %v1635_v62 }
 0x2c5   :  { %2433 = vmatmul.mubr.bf16.vlgmr.msra.gmra.mrb[0].mxu1 %v1679_v59 }
 0x2c6   :  { %2454 = vmatpush1.bf16.msra.mxu1 %v3646_v58  ;;  %v3710_v58 = vld [vmem:[%s5205_s5 + $0x350] ss:$8 sps:$4 sm:$0xff]  }
 0x2c7   :  { %2455 = vmatprep.subr.bf16.mxu1 %v3651_v0 }
 0x2c9   :  { %v4851_v43 = vpop.permute.xlu1 %1631  ;;  %v1630_v46 = vpop.permute.xlu0 %1629 }
 0x2ca   :  { %2456 = vmatpush1.bf16.msra.mxu1 %v3649_v15  ;;  %v1637_v54 = vsel %vm5252_vm12, %v1630_v46, %v4851_v43  ;;  %v1683_v4 = vsel %vm5253_vm1, %v3118_v10, %v1630_v46  ;;  %v2627_v46 = vld [vmem:[%s5208_s8] sm:$0xff]  ;;  %vm2822_vm12 = vcmask 31744  }
 0x2cb   :  { %2442 = vmatprep.mubr.bf16.mxu1 %v1637_v54  ;;  %2457 = vmatprep.subr.bf16.mxu1 %v3654_v8  ;;  %v2643_v8 = vld [vmem:[%s5208_s8 + $0x80] sm:$0xff] }
 0x2cd   :  { %2443 = vmatmul.mubr.bf16.gmra.mrb[4].mxu1 %v1683_v4  ;;  %v1628_v60 = vpop.permute.xlu0 %1627  ;;  %v1660_v1 = vpop.permute.xlu1 %1659 }
 0x2ce   :  { %2458 = vmatpush1.bf16.msra.mxu1 %v3652_v2  ;;  %v1636_v39 = vsel %vm5255_vm0, %v4831_v57, %v1628_v60  ;;  %v3707_v57 = vld [vmem:[%s5205_s5 + $0x340] ss:$8 sps:$4 sm:$0xff]   ;;  %v2646_v60 = vld [vmem:[%s5208_s8 + $0x98] sm:$0xff] }
 0x2cf   :  { %2459 = vmatprep.subr.bf16.mxu1 %v3658_v7  ;;  %v1687_v19 = vsel %vm5256_vm15, %v1636_v39, %v1660_v1  ;;  %v2628_v2 = vld [vmem:[%s5208_s8 + $0x8] sm:$0xff]  ;;  %v2645_v7 = vld [vmem:[%s5208_s8 + $0x90] sm:$0xff]  ;;  %v3726_v39 = vmov 0.0  }
 0x2d0   :  { %v3296_v4 = vpack.c.bf16 %v2628_v2, %v2627_v46 }
 0x2d1   :  { %v4871_v10 = vpop.permute.xlu0 %1661  ;;  %v1634_v38 = vpop.permute.xlu1 %1633 }
 0x2d2   :  { %2460 = vmatpush1.bf16.msra.mxu1 %v3656_v12  ;;  %v1671_v53 = vsel %vm5254_vm7, %v1660_v1, %v4871_v10  ;;  %v1638_v14 = vsel %vm5258_vm10, %v4851_v43, %v1634_v38  ;;  %v2644_v43 = vld [vmem:[%s5208_s8 + $0x88] sm:$0xff]  ;;  %v2629_v12 = vld [vmem:[%s5208_s8 + $0x10] sm:$0xff]  ;;  %v2630_v1 = vld [vmem:[%s5208_s8 + $0x18] sm:$0xff] }
 0x2d3   :  { %2461 = vmatprep.subr.bf16.mxu1 %v3661_v56  ;;  %2485 = vmatprep.mubr.bf16.mxu1 %v1671_v53  ;;  %v3294_v54 = vpack.c.bf16 %v2644_v43, %v2643_v8  ;;  %v3298_v56 = vpack.c.bf16 %v2646_v60, %v2645_v7  ;;  %v3300_v53 = vpack.c.bf16 %v2630_v1, %v2629_v12  ;;  %v2655_v38 = vld [vmem:[%s5208_s8 + $0xe0] sm:$0xff] }
 0x2d5   :  { %v1668_v3 = vpop.permute.xlu1 %1667  ;;  %v1666_v40 = vpop.permute.xlu0 %1665  ;;  %3295 = vmatprep.subr.bf16.mxu0 %v3294_v54 }
 0x2d6   :  { %2462 = vmatpush1.bf16.msra.mxu1 %v3659_v9  ;;  %v1673_v51 = vsel %vm5257_vm8, %v1666_v40, %v1668_v3  ;;  %v1691_v23 = vsel %vm5259_vm14, %v1638_v14, %v1666_v40  ;;  %3297 = vmatpush3.bf16.msra.mxu0 %v3296_v4  ;;  %v2648_v9 = vld [vmem:[%s5208_s8 + $0xa8] sm:$0xff]  ;;  %v2642_v14 = vld [vmem:[%s5208_s8 + $0x78] sm:$0xff] }
 0x2d7   :  { %2463 = vmatprep.subr.bf16.mxu1 %v3664_v52  ;;  %3299 = vmatprep.subr.bf16.mxu0 %v3298_v56 }
 0x2d9   :  { %v1664_v59 = vpop.permute.xlu0 %1663  ;;  %v1670_v0 = vpop.permute.xlu1 %1669 }
 0x2da   :  { %2464 = vmatpush1.bf16.msra.mxu1 %v3662_v13  ;;  %v1672_v62 = vsel %vm5260_vm2, %v4871_v10, %v1664_v59  ;;  %v1674_v15 = vsel %vm5262_vm6, %v1668_v3, %v1670_v0  ;;  %v2647_v10 = vld [vmem:[%s5208_s8 + $0xa0] sm:$0xff]  ;;  %3301 = vmatpush3.bf16.msra.mxu0 %v3300_v53 }
 0x2db   :  { %2465 = vmatprep.subr.bf16.mxu1 %v3667_v16  ;;  %v3302_v52 = vpack.c.bf16 %v2648_v9, %v2647_v10  ;;  %v2631_v13 = vld [vmem:[%s5208_s8 + $0x20] sm:$0xff]  ;;  %v2632_v16 = vld [vmem:[%s5208_s8 + $0x28] sm:$0xff] }
 0x2dc   :  { %v3713_v3 = vld [vmem:[%s5209_s9] sm:$0xff]  }
 0x2dd   :  { %3303 = vmatprep.subr.bf16.mxu0 %v3302_v52 }
 0x2de   :  { %2466 = vmatpush1.bf16.msra.mxu1 %v3665_v17  ;;  %v3304_v17 = vpack.c.bf16 %v2632_v16, %v2631_v13 }
 0x2df   :  { %2467 = vmatprep.subr.bf16.mxu1 %v3670_v20  ;;  %v2649_v20 = vld [vmem:[%s5208_s8 + $0xb0] sm:$0xff] }
 0x2e0   :  { %3305 = vmatpush3.bf16.msra.mxu0 %v3304_v17 }
 0x2e2   :  { %2468 = vmatpush1.bf16.msra.mxu1 %v3668_v21  ;;  %v2650_v21 = vld [vmem:[%s5208_s8 + $0xb8] sm:$0xff] }
 0x2e3   :  { %2469 = vmatprep.subr.bf16.mxu1 %v3673_v22  ;;  %v2633_v22 = vld [vmem:[%s5208_s8 + $0x30] sm:$0xff] }
 0x2e6   :  { %2470 = vmatpush1.bf16.msra.mxu1 %v3671_v30  ;;  %v3306_v30 = vpack.c.bf16 %v2650_v21, %v2649_v20 }
 0x2e7   :  { %2471 = vmatprep.subr.bf16.mxu1 %v3676_v25  ;;  %v2634_v25 = vld [vmem:[%s5208_s8 + $0x38] sm:$0xff] }
 0x2e8   :  { %3307 = vmatprep.subr.bf16.mxu0 %v3306_v30 }
 0x2ea   :  { %2472 = vmatpush1.bf16.msra.mxu1 %v3674_v26  ;;  %v2651_v26 = vld [vmem:[%s5208_s8 + $0xc0] sm:$0xff] }
 0x2eb   :  { %2473 = vmatprep.subr.bf16.mxu1 %v3679_v27  ;;  %v2652_v27 = vld [vmem:[%s5208_s8 + $0xc8] sm:$0xff] }
 0x2ee   :  { %2474 = vmatpush1.bf16.msra.mxu1 %v3677_v28  ;;  %v3308_v28 = vpack.c.bf16 %v2634_v25, %v2633_v22 }
 0x2ef   :  { %2475 = vmatprep.subr.bf16.mxu1 %v3682_v29  ;;  %v3310_v29 = vpack.c.bf16 %v2652_v27, %v2651_v26 }
 0x2f0   :  { %3309 = vmatpush3.bf16.msra.mxu0 %v3308_v28 }
 0x2f1   :  { %3311 = vmatprep.subr.bf16.mxu0 %v3310_v29 }
 0x2f2   :  { %2476 = vmatpush1.bf16.msra.mxu1 %v3680_v49  ;;  %v2635_v49 = vld [vmem:[%s5208_s8 + $0x40] sm:$0xff] }
 0x2f3   :  { %2477 = vmatprep.subr.bf16.mxu1 %v3685_v44  ;;  %v2636_v44 = vld [vmem:[%s5208_s8 + $0x48] sm:$0xff] }
 0x2f6   :  { %2478 = vmatpush1.bf16.msra.mxu1 %v3683_v36  ;;  %v2653_v36 = vld [vmem:[%s5208_s8 + $0xd0] sm:$0xff] }
 0x2f7   :  { %2479 = vmatprep.subr.bf16.mxu1 %v3688_v31  ;;  %v2654_v31 = vld [vmem:[%s5208_s8 + $0xd8] sm:$0xff] }
 0x2fa   :  { %2480 = vmatpush1.bf16.msra.mxu1 %v3686_v32  ;;  %v3312_v32 = vpack.c.bf16 %v2636_v44, %v2635_v49 }
 0x2fb   :  { %2481 = vmatprep.subr.bf16.mxu1 %v3691_v33  ;;  %v3314_v33 = vpack.c.bf16 %v2654_v31, %v2653_v36 }
 0x2fc   :  { %3313 = vmatpush3.bf16.msra.mxu0 %v3312_v32 }
 0x2fd   :  { %3315 = vmatprep.subr.bf16.mxu0 %v3314_v33 }
 0x2fe   :  { %2482 = vmatpush1.bf16.msra.mxu1 %v3689_v34  ;;  %v2637_v34 = vld [vmem:[%s5208_s8 + $0x50] sm:$0xff] }
 0x2ff   :  { %2483 = vmatprep.subr.bf16.mxu1 %v3694_v35  ;;  %v2638_v35 = vld [vmem:[%s5208_s8 + $0x58] sm:$0xff] }
 0x302   :  { %2484 = vmatpush1.bf16.msra.mxu1 %v3692_v42  ;;  %v2656_v42 = vld [vmem:[%s5208_s8 + $0xe8] sm:$0xff] }
 0x303   :  { %2506 = vmatprep.subr.bf16.mxu1 %v3697_v37  ;;  %v3316_v37 = vpack.c.bf16 %v2638_v35, %v2637_v34  ;;  %v3318_v40 = vpack.c.bf16 %v2656_v42, %v2655_v38 }
 0x305   :  { %2486 = vmatmul.mubr.bf16.vlgmr.msra.gmra.mrb[0].mxu1 %v1687_v19  ;;  %v2657_v19 = vld [vmem:[%s5208_s8 + $0xf0] sm:$0xff]  ;;  %3317 = vmatpush3.bf16.msra.mxu0 %v3316_v37 }
 0x306   :  { %2495 = vmatprep.mubr.bf16.mxu1 %v1673_v51  ;;  %2507 = vmatpush1.bf16.msra.mxu1 %v3695_v41  ;;  %v2639_v41 = vld [vmem:[%s5208_s8 + $0x60] sm:$0xff]  ;;  %v2658_v51 = vld [vmem:[%s5208_s8 + $0xf8] sm:$0xff] }
 0x307   :  { %2508 = vmatprep.subr.bf16.mxu1 %v3700_v45  ;;  %v2640_v45 = vld [vmem:[%s5208_s8 + $0x68] sm:$0xff]  ;;  %3319 = vmatprep.subr.bf16.mxu0 %v3318_v40 }
 0x30a   :  { %2509 = vmatpush1.bf16.msra.mxu1 %v3698_v5  ;;  %v3320_v5 = vpack.c.bf16 %v2640_v45, %v2639_v41 }
 0x30b   :  { %2510 = vmatprep.subr.bf16.mxu1 %v3703_v6  ;;  %v3322_v6 = vpack.c.bf16 %v2658_v51, %v2657_v19 }
 0x30c   :  { %3321 = vmatpush3.bf16.msra.mxu0 %v3320_v5 }
 0x30d   :  { %2496 = vmatmul.mubr.bf16.gmra.mrb[4].mxu1 %v1691_v23  ;;  %3323 = vmatprep.subr.bf16.mxu0 %v3322_v6  ;;  %v2559_v23 = vld [vmem:[%s5210_s6] sm:$0x3] }
 0x30e   :  { %2511 = vmatpush1.bf16.msra.mxu1 %v3701_v55  ;;  %2538 = vmatprep.mubr.bf16.mxu1 %v3724_v11  ;;  %v2641_v55 = vld [vmem:[%s5208_s8 + $0x70] sm:$0xff] }
 0x30f   :  { %2512 = vmatprep.subr.bf16.mxu1 %v3706_v18  ;;  %v3324_v18 = vpack.c.bf16 %v2642_v14, %v2641_v55 }
 0x311   :  { %3325 = vmatpush3.bf16.msra.mxu0 %v3324_v18 }
 0x312   :  { %2513 = vmatpush1.bf16.msra.mxu1 %v3704_v24  ;;  %v2564_v24 = vrot.slane %v2559_v23, %v4469_v48 }
 0x313   :  { %2514 = vmatprep.subr.bf16.mxu1 %v3709_v47  ;;  %v2579_v47 = vld [vmem:[%s5211_s7] sm:$0x3] }
 0x314   :  { %v2584_v59 = vrot.slane %v2579_v47, %v4469_v48 }
 0x316   :  { %2515 = vmatpush1.bf16.msra.mxu1 %v3707_v57  ;;  %v2568_v57 = vrot.slane %v2559_v23, %v4475_v63 }
 0x317   :  { %2516 = vmatprep.subr.bf16.mxu1 %v3712_v50 }
 0x31a   :  { %2517 = vmatpush1.bf16.msra.mxu1 %v3710_v58 }
 0x31b   :  { %3288 = vmatprep.subr.bf16.mxu1 %v3726_v39 }
 0x31d   :  { %3239 = vmatmul.mubr.msk.bf16.vlgmr.msra.gmra.mrb[0].mxu1 %vm5261_vm11, %v1672_v62 }
 0x31e   :  { %2548 = vmatprep.mubr.bf16.mxu1 %v3724_v11  ;;  %3289 = vmatpush3.bf16.msra.mxu1 %v3713_v3 }
 0x325   :  { %3240 = vmatmul.mubr.msk.bf16.gmra.mrb[4].mxu1 %vm5263_vm3, %v1674_v15  ;;  %v2588_v15 = vrot.slane %v2579_v47, %v4475_v63 }
 0x326   :  { %3290 = vmatprep.mubr.msk.bf16.mxu1 %vm3727_vm4, %v3726_v39  ;;  %v3241_v39 = vld [vmem:[%s5213_s10] ss:$0 sm:$0xff] }
 0x3f0   :  { %v2540_v50 = vpop.f32.mrb[0].mxu1 }
 0x3f1   :  { %v2571_v58 = vmul.f32 %v2564_v24, %v2540_v50  ;;  %v2542_v62 = vpop.f32.mrb[1].mxu1 }
 0x3f2   :  { %v2572_v0 = vmul.f32 %v2568_v57, %v2542_v62  ;;  %v2544_v8 = vpop.f32.mrb[2].mxu1 }
 0x3f3   :  { %v2573_v43 = vmul.f32 %v2564_v24, %v2544_v8  ;;  %v2546_v46 = vpop.f32.mrb[3].mxu1  ;;  %v5104_v2 = vadd.f32 %v2584_v59, %v2571_v58 }
 0x3f4   :  { %v2574_v54 = vmul.f32 %v2568_v57, %v2546_v46  ;;  %v5108_v7 = vadd.f32 %v2588_v15, %v2572_v0 }
 0x3f5   :  { %v5106_v4 = vadd.f32 %v2584_v59, %v2573_v43 }
 0x3f6   :  { %v5110_v60 = vadd.f32 %v2588_v15, %v2574_v54 }
 0x3f7   :  { %v2599_v12 = vadd.f32 %v5106_v4, %v5104_v2 }
 0x3f8   :  { %v2606_v56 = vadd.f32 %v5110_v60, %v5108_v7  ;;  %v2550_v1 = vpop.f32.mrb[4].mxu1 }
 0x3f9   :  { %v2600_v10 = vrot.slane %v2599_v12, 4  ;;  %v2575_v9 = vmul.f32 %v2564_v24, %v2550_v1  ;;  %v2552_v53 = vpop.f32.mrb[5].mxu1 }
 0x3fa   :  { %v2607_v52 = vrot.slane %v2606_v56, 4  ;;  %v2576_v13 = vmul.f32 %v2568_v57, %v2552_v53  ;;  %v2554_v16 = vpop.f32.mrb[6].mxu1 }
 0x3fb   :  { %v2577_v17 = vmul.f32 %v2564_v24, %v2554_v16  ;;  %v2556_v20 = vpop.f32.mrb[7].mxu1  ;;  %v2601_v30 = vadd.f32 %v2600_v10, %v2599_v12  ;;  %v5116_v25 = vadd.f32 %v2584_v59, %v2575_v9  ;;  %v3244_v24 = vld.sshfl [vmem:[%s5212_s11] sm:$0x33 pattern:$0x76325410] }
 0x3fc   :  { %v2608_v21 = vadd.f32 %v2607_v52, %v2606_v56  ;;  %v2578_v22 = vmul.f32 %v2568_v57, %v2556_v20  ;;  %v5120_v27 = vadd.f32 %v2588_v15, %v2576_v13  ;;  %v2821_v47 = vcombine.high %v3244_v24, %v3244_v24  ;;  %v2801_v56 = vld [vmem:[%s5214_s12] sm:$0x3] }
 0x3fd   :  { %v5118_v26 = vadd.f32 %v2584_v59, %v2577_v17  ;;  %v2602_v36 = vrot.slane %v2601_v30, 2  ;;  %v2828_v57 = vsel %vm2826_vm5, %v3244_v24, 0  ;;  %v2806_v1 = vrot.slane %v2801_v56, %v4469_v48  ;;  %v2944_v24 = vld [vmem:[%s5215_s1 + $0x38] sm:$0xff] }
 0x3fe   :  { %v5122_v28 = vadd.f32 %v2588_v15, %v2578_v22  ;;  %v2609_v49 = vrot.slane %v2608_v21, 2  ;;  %3245 = vmatprep.subr.msk.bf16.mxu1 %vm2826_vm5, %v2821_v47 }
 0x3ff   :  { %v2613_v29 = vadd.f32 %v5118_v26, %v5116_v25  ;;  %v2603_v38 = vadd.f32 %v2602_v36, %v2601_v30  ;;  %v3728_v36 = vmov 1966171168  }
 0x400   :  { %v2620_v44 = vadd.f32 %v5122_v28, %v5120_v27  ;;  %v2610_v35 = vadd.f32 %v2609_v49, %v2608_v21 }
 0x401   :  { %v2614_v31 = vrot.slane %v2613_v29, 4  ;;  %v2604_v45 = vrot.slane %v2603_v38, 1 }
 0x402   :  { %v2621_v32 = vrot.slane %v2620_v44, 4  ;;  %v2611_v40 = vrot.slane %v2610_v35, 1 }
 0x403   :  { %v2615_v33 = vadd.f32 %v2614_v31, %v2613_v29  ;;  %v2605_v14 = vadd.f32 %v2604_v45, %v2603_v38  ;;  %v2888_v31 = vunpack.c.l.s4 %v3728_v36 }
 0x404   :  { %v2622_v34 = vadd.f32 %v2621_v32, %v2620_v44  ;;  %v2612_v6 = vadd.f32 %v2611_v40, %v2610_v35 }
 0x405   :  { %v2616_v42 = vrot.slane %v2615_v33, 2  ;;  %v2889_v32 = vunpack.c.0.s8 %v2888_v31 }
 0x406   :  { %v2623_v37 = vrot.slane %v2622_v34, 2 }
 0x407   :  { %v2617_v3 = vadd.f32 %v2616_v42, %v2615_v33 }
 0x408   :  { %v2624_v41 = vadd.f32 %v2623_v37, %v2622_v34  ;;  %v2892_v34 = vsub.s32 %v2889_v32, %v4466_v61 }
 0x409   :  { %v2618_v19 = vrot.slane %v2617_v3, 1 }
 0x40a   :  { %v2625_v51 = vrot.slane %v2624_v41, 1 }
 0x40b   :  { %v2619_v5 = vadd.f32 %v2618_v19, %v2617_v3  ;;  %v2937_v19 = vld [vmem:[%s5215_s1] sm:$0xff] }
 0x40c   :  { %v2626_v55 = vadd.f32 %v2625_v51, %v2624_v41  ;;  %v2938_v51 = vld [vmem:[%s5215_s1 + $0x8] sm:$0xff] }
 0x40d   :  { %v2664_v23 = vsel %vm2663_vm9, %v2619_v5, %v2605_v14  ;;  %v2939_v14 = vld [vmem:[%s5215_s1 + $0x10] sm:$0xff] }
 0x40e   :  { %v2665_v18 = vsel %vm2663_vm9, %v2626_v55, %v2612_v6 }
 0x40f   :  { %2732 = vmatprep.mubr.f32.mxu0 %v2665_v18  ;;  %v2940_v18 = vld [vmem:[%s5215_s1 + $0x18] sm:$0xff] }
 0x410   :  { %2733 = vmatmul.mubr.f32.vlgmr.msra.gmra.mrb[8].mxu0 %v2664_v23  ;;  %v2941_v23 = vld [vmem:[%s5215_s1 + $0x20] sm:$0xff] }
 0x4e3   :  { %v3283_v50 = vpop.f32.mrb[8].mxu0 }
 0x4e4   :  { %v3284_v58 = vpop.f32.mrb[9].mxu0 }
 0x4e5   :  { %v3285_v59 = vadd.f32 %v3284_v58, %v3283_v50 }
 0x4e7   :  { %v2738_v62 = vpack.c.bf16 %v3285_v59, %v3285_v59 }
 0x4e9   :  { %3291 = vmatmul.mubr.msk.bf16.vlgmr.msra.gmra.mrb[8].mxu1 %vm1365_vm13, %v2738_v62 }
 0x4ea   :  { %2834 = vmatpush1.bf16.msra.mxu1 %v2828_v57  ;;  %2865 = vmatprep.mubr.bf16.mxu1 %v3724_v11  ;;  %v2810_v11 = vrot.slane %v2801_v56, %v4475_v63 }
 0x5bc   :  { %v2792_v0 = vpop.f32.mrb[8].mxu1 }
 0x5bd   :  { %v2793_v15 = vadd.f32 %v3241_v39, %v2792_v0  ;;  %v3292_v8 = vpop.f32.mrb[9].mxu1 }
 0x5be   :  { %v2795_v43 = vpop.f32.mrb[10].mxu1 }
 0x5bf   :  { %v2798_v46 = vmax.f32 %v2793_v15, 0.0  ;;  %v3293_v54 = vpop.f32.mrb[11].mxu1 }
 0x5c1   :  { %v2799_v12 = vpack.c.bf16 %v2798_v46, %v2798_v46 }
 0x5c3   :  { %3246 = vmatmul.mubr.msk.bf16.vlgmr.msra.gmra.mrb[12].mxu1 %vm2822_vm12, %v2799_v12 }
 0x696   :  { %v2867_v10 = vpop.f32.mrb[12].mxu1 }
 0x697   :  { %v2868_v9 = vadd.f32 %v2867_v10, %v2806_v1  ;;  %v2869_v53 = vpop.f32.mrb[13].mxu1 }
 0x698   :  { %v2870_v52 = vadd.f32 %v2869_v53, %v2810_v11  ;;  %v2871_v13 = vpop.f32.mrb[14].mxu1 }
 0x699   :  { %v2874_v16 = vsub.f32 0.0, %v2868_v9  ;;  %v2872_v17 = vpop.f32.mrb[15].mxu1 }
 0x69a   :  { %v2875_v20 = vsub.f32 0.0, %v2870_v52 }
 0x69b   :  { %v2876_v21 = vmul.f32 1.442695, %v2874_v16 }
 0x69c   :  { %v2878_v22 = vmul.f32 1.442695, %v2875_v20 }
 0x69d   :  { %3714 = vpow2.f32 %v2876_v21 }
 0x69e   :  { %3716 = vpow2.f32 %v2878_v22 }
 0x6a7   :  { %v3715_v30 = vpop.eup %3714 }
 0x6a8   :  { %v3717_v29 = vpop.eup %3716  ;;  %v2880_v49 = vadd.f32 1.0, %v3715_v30 }
 0x6a9   :  { %v2881_v44 = vadd.f32 1.0, %v3717_v29 }
 0x6aa   :  { %3718 = vrcp.f32 %v2880_v49 }
 0x6ab   :  { %3720 = vrcp.f32 %v2881_v44 }
 0x6b4   :  { %v3719_v33 = vpop.eup %3718 }
 0x6b5   :  { %v3721_v35 = vpop.eup %3720 }
 0x6b6   :  { %v2886_v38 = vcombine.low %v3719_v33, %v3721_v35 }
 0x6b8   :  { %v2893_v42 = vrot.slane %v2886_v38, %v2892_v34 }
 0x6ba   :  { %v2894_v37 = vcombine.high %v2893_v42, %v2893_v42  ;;  %v2901_v3 = vrot.slane %v2893_v42, %v2892_v34 }
 0x6bc   :  { %v2908_v40 = vrot.slane %v2894_v37, %v2892_v34  ;;  %v2912_v41 = vrot.slane %v2901_v3, %v4469_v48  ;;  %v2916_v45 = vrot.slane %v2901_v3, %v4475_v63 }
 0x6be   :  { %v2920_v61 = vrot.slane %v2908_v40, %v4469_v48  ;;  %v2924_v5 = vrot.slane %v2908_v40, %v4475_v63  ;;  %v2929_v6 = vmul.f32 %v2912_v41, %v5104_v2  ;;  %v2930_v55 = vmul.f32 %v2916_v45, %v5108_v7  ;;  %v2942_v2 = vld [vmem:[%s5215_s1 + $0x28] sm:$0xff]  ;;  %v2943_v7 = vld [vmem:[%s5215_s1 + $0x30] sm:$0xff] }
 0x6bf   :  { %v2931_v48 = vmul.f32 %v2912_v41, %v5106_v4  ;;  %v2932_v63 = vmul.f32 %v2916_v45, %v5110_v60 }
 0x6c0   :  { %v2933_v47 = vmul.f32 %v2920_v61, %v5116_v25  ;;  %v2934_v57 = vmul.f32 %v2924_v5, %v5120_v27  ;;  %v2935_v4 = vmul.f32 %v2920_v61, %v5118_v26  ;;  %v2936_v60 = vmul.f32 %v2924_v5, %v5122_v28 }
 0x6c1   :  { %v2945_v50 = vadd.f32 %v2937_v19, %v2929_v6  ;;  %v2946_v58 = vadd.f32 %v2938_v51, %v2930_v55  ;;  %v2947_v59 = vadd.f32 %v2939_v14, %v2931_v48  ;;  %v2948_v62 = vadd.f32 %v2940_v18, %v2932_v63 }
 0x6c2   :  { %v2949_v39 = vadd.f32 %v2941_v23, %v2933_v47  ;;  %v2950_v0 = vadd.f32 %v2942_v2, %v2934_v57  ;;  %v2951_v15 = vadd.f32 %v2943_v7, %v2935_v4  ;;  %v2952_v8 = vadd.f32 %v2944_v24, %v2936_v60 }
 0x6c3   :  { %v2953_v43 = vmax.f32 %v2945_v50, 0.0  ;;  %v2954_v46 = vmax.f32 %v2946_v58, 0.0  ;;  %v2955_v54 = vmax.f32 %v2947_v59, 0.0  ;;  %v2956_v12 = vmax.f32 %v2948_v62, 0.0 }
 0x6c4   :  { %v2957_v56 = vmax.f32 %v2949_v39, 0.0  ;;  %v2958_v25 = vmax.f32 %v2950_v0, 0.0  ;;  %v2959_v1 = vmax.f32 %v2951_v15, 0.0  ;;  %v2960_v27 = vmax.f32 %v2952_v8, 0.0 }
 0x6c5   :  { %2961 = vst [vmem:[%s5216_s13] sm:$0xff] %v2953_v43  ;;  %2962 = vst [vmem:[%s5216_s13 + $0x8] sm:$0xff] %v2954_v46 }
 0x6c6   :  { %2963 = vst [vmem:[%s5216_s13 + $0x10] sm:$0xff] %v2955_v54  ;;  %2964 = vst [vmem:[%s5216_s13 + $0x18] sm:$0xff] %v2956_v12 }
 0x6c7   :  { %2965 = vst [vmem:[%s5216_s13 + $0x20] sm:$0xff] %v2957_v56  ;;  %2966 = vst [vmem:[%s5216_s13 + $0x28] sm:$0xff] %v2958_v25 }
 0x6c8   :  { %2967 = vst [vmem:[%s5216_s13 + $0x30] sm:$0xff] %v2959_v1  ;;  %2968 = vst [vmem:[%s5216_s13 + $0x38] sm:$0xff] %v2960_v27 }

</bundles_post_ra>
